<compile_context>
chip_gen: v7x
topology: tpu7x:2x2x1
jax: 0.10.0
libtpu: 0.0.40
codegen_flags: <defaults>
</compile_context>

<pallas_src>
import jax
import jax.numpy as jnp
from jax.experimental import pallas as pl
from jax.experimental.pallas import tpu as pltpu

BN_EPS = 1e-5
NORM_EPS = 1e-12
LANE = 128


def _ceil_to(x, m):
    return (x + m - 1) // m * m


# ------------------------------ Pallas kernel ------------------------------ #
def _mapper_kernel(xin_ref, w_se0_ref, w_big_ref, w_t1_ref, w_t2_ref, w_e3_ref,
                   b_ref, out_ref):
    """5 lane-dense MXU matmuls + VPU/XLU magnitude head per batch block."""
    f32 = jnp.float32
    wdt = w_big_ref.dtype                  # bf16 (production) or f32 (exact mode)
    P_S = w_e3_ref.shape[1]                # lane-padded shape-latent width
    P_M2 = w_t2_ref.shape[1] - P_S         # lane-padded mag penultimate width
    relu = lambda v: jnp.maximum(v, 0.0)

    def mm(lhs, w_ref):                    # MXU: wdt operands, f32 accumulation
        return jnp.dot(lhs.astype(wdt), w_ref[...], preferred_element_type=f32)

    def brow(r, n):                        # (1, n) f32 bias row; n % 128 == 0
        return b_ref[r:r + 1, 0:n]

    xw = xin_ref[...].astype(wdt)          # packed [x_a | embed_ab], cast once

    # shape_encoder layer 0: Linear (+folded BN) + ReLU  (Dropout = id in eval)
    h = relu(mm(xw, w_se0_ref) + brow(0, w_se0_ref.shape[1]))

    # fused [editor | mag] first layer; shape_encoder's 2nd Linear folded in host-side
    z = jnp.concatenate([h.astype(wdt), xw], axis=-1)
    fused = relu(mm(z, w_big_ref) + brow(1, w_big_ref.shape[1]))

    # block-diagonally fused tails [e1 | m1] then [e2 | m2]; padded lanes stay 0
    t1 = relu(mm(fused, w_t1_ref) + brow(2, w_t1_ref.shape[1]))
    t2 = relu(mm(t1, w_t2_ref) + brow(3, w_t2_ref.shape[1]))

    # editor final Linear (no bias) + F.normalize(dim=1).  Columns >= S are
    # exactly zero, so the P_S-lane reduction equals the true S-wide norm.
    e = mm(t2[:, 0:P_S], w_e3_ref)
    inv = jax.lax.rsqrt(jnp.maximum(jnp.sum(e * e, axis=-1, keepdims=True),
                                    NORM_EPS * NORM_EPS))        # EUP rsqrt
    e = e * inv

    # magnitude head (M2 -> 1): VPU multiply + XLU lane reduction instead of a
    # 1-wide MXU matmul.  Lane M2 of the mag block of t2 is a constant 1.0 so
    # b_m3 rides inside the weight row (no masked scalar slice).
    mag = relu(jnp.sum(t2[:, P_S:P_S + P_M2] * brow(4, P_M2),
                       axis=-1, keepdims=True))

    out_ref[...] = (e * mag).astype(out_ref.dtype)


# -------------------------------- wrapper ----------------------------------- #
def mlp_latent_mapper_bottlenecked(x_a, embed_ab, packed, *, block_b=256,
                                   return_padded=False):
    """Eval-mode forward. `packed` comes from pack_params().

    Returns (B, S) by default, or the lane-dense (B, 128-multiple) slab when
    return_padded=True (skips an extra HBM round-trip for the final slice).
    """
    meta = packed["meta"]
    S, T, P_S, P_in = meta["S"], meta["T"], meta["P_S"], meta["P_in"]
    B = x_a.shape[0]
    assert x_a.shape == (B, S) and embed_ab.shape == (B, T)

    # pack [x_a | embed_ab] into one lane-padded activation stream (single DMA)
    xin = jnp.zeros((B, P_in), x_a.dtype)
    xin = xin.at[:, :S].set(x_a).at[:, S:S + T].set(embed_ab.astype(x_a.dtype))

    weights = (packed["w_se0"], packed["w_big"], packed["w_t1"],
               packed["w_t2"], packed["w_e3"], packed["bias"])

    if block_b is None or B <= block_b:
        # Latency path: no grid (no degenerate 1-step pipeline); everything
        # resident in VMEM (few hundred KiB total).
        vmem = pl.BlockSpec(memory_space=pltpu.MemorySpace.VMEM)
        out = pl.pallas_call(
            _mapper_kernel,
            out_shape=jax.ShapeDtypeStruct((B, P_S), x_a.dtype),
            in_specs=[vmem] * (1 + len(weights)),
            out_specs=vmem,
        )(xin, *weights)
    else:
        # Production path: pad B to a multiple of block_b (no whole-array-in-VMEM
        # fallback), tile the batch, keep weights VMEM-resident (constant block
        # index), and let the runtime split batch blocks across cores.
        # NOTE(v7x): if "parallel" doesn't split across the 2 TensorCores, use
        # pltpu.CORE_PARALLEL here instead.
        Bp = _ceil_to(B, block_b)
        if Bp != B:
            xin = jnp.zeros((Bp, P_in), xin.dtype).at[:B].set(xin)
        nb = Bp // block_b
        const = lambda a: pl.BlockSpec(a.shape, lambda i: (0, 0))
        out = pl.pallas_call(
            _mapper_kernel,
            out_shape=jax.ShapeDtypeStruct((Bp, P_S), x_a.dtype),
            grid=(nb,),
            in_specs=[pl.BlockSpec((block_b, P_in), lambda i: (i, 0))]
                     + [const(w) for w in weights],
            out_specs=pl.BlockSpec((block_b, P_S), lambda i: (i, 0)),
            compiler_params=pltpu.CompilerParams(
                dimension_semantics=("parallel",),
            ),
        )(xin, *weights)
        out = out[:B]
    return out if return_padded else out[:, :S]


# --------------------------- parameter packing ------------------------------ #
def pack_params(p, weight_dtype=jnp.bfloat16):
    """Fold / fuse / lane-pad all parameters host-side (all folds done in f32).

    Produces 5 weight slabs + 1 f32 bias slab, all with 128-multiple lane widths:
      w_se0 : (P_in, P_S)          shape_encoder L0 on packed [x_a|emb]
      w_big : (P_S+P_in, Nf)       fused [editor|mag] L0 with se1 folded in
      w_t1  : (Nf, P_S+P_M1)       block-diag [w_e1 | w_m1]
      w_t2  : (P_S+P_M1, P_S+P_M2) block-diag [w_e2 | w_m2] (+ constant-1 lane)
      w_e3  : (P_S, P_S)           editor final Linear (no bias)
      bias  : (8, Wb) f32          rows 0..3 = layer biases, row 4 = [w_m3|b_m3]
    """
    f32 = jnp.float32
    hp = jax.lax.Precision.HIGHEST
    S = p["w_se0"].shape[0]
    in_dim, BOT = p["w_e0"].shape
    T = in_dim - S
    M0 = p["w_m0"].shape[1]
    M1 = p["w_m1"].shape[1]
    M2 = p["w_m2"].shape[1]

    P_S = _ceil_to(S, LANE)
    P_in = _ceil_to(S + T, LANE)
    P_B = _ceil_to(BOT, LANE)
    P_M0 = _ceil_to(M0, LANE)
    P_M1 = _ceil_to(M1, LANE)
    P_M2 = _ceil_to(M2 + 1, LANE)      # +1 reserves the constant-1 lane for b_m3
    N_f = P_B + P_M0
    N_t1 = P_S + P_M1
    N_t2 = P_S + P_M2

    z = lambda shape: jnp.zeros(shape, f32)

    # layer 0 of shape_encoder, applied to the packed [x_a | emb] input
    w_se0 = z((P_in, P_S)).at[:S, :S].set(p["w_se0"])        # emb / pad rows = 0
    b0 = z((P_S,)).at[:S].set(p["b_se0"])

    # fused first layer of editor||mag with se1 folded in (exact linear fold):
    #   [se1(h)|emb] @ [W_e0|W_m0] == h @ (W_se1@W[:S]) + emb @ W[S:] + b_se1@W[:S]
    w_wide = jnp.concatenate([p["w_e0"], p["w_m0"]], axis=1)           # (S+T, BOT+M0)
    w_h = jnp.dot(p["w_se1"], w_wide[:S], precision=hp)                # (S, BOT+M0)
    b_fold = jnp.dot(p["b_se1"], w_wide[:S], precision=hp)             # (BOT+M0,)
    w_big = z((P_S + P_in, N_f))
    w_big = w_big.at[:S, :BOT].set(w_h[:, :BOT])
    w_big = w_big.at[:S, P_B:P_B + M0].set(w_h[:, BOT:])
    w_big = w_big.at[P_S + S:P_S + S + T, :BOT].set(w_wide[S:, :BOT])
    w_big = w_big.at[P_S + S:P_S + S + T, P_B:P_B + M0].set(w_wide[S:, BOT:])
    b1 = z((N_f,))
    b1 = b1.at[:BOT].set(p["b_e0"] + b_fold[:BOT])
    b1 = b1.at[P_B:P_B + M0].set(p["b_m0"] + b_fold[BOT:])

    # block-diagonally fused tails
    w_t1 = z((N_f, N_t1))
    w_t1 = w_t1.at[:BOT, :S].set(p["w_e1"])
    w_t1 = w_t1.at[P_B:P_B + M0, P_S:P_S + M1].set(p["w_m1"])
    b2 = z((N_t1,)).at[:S].set(p["b_e1"]).at[P_S:P_S + M1].set(p["b_m1"])

    w_t2 = z((N_t1, N_t2))
    w_t2 = w_t2.at[:S, :S].set(p["w_e2"])
    w_t2 = w_t2.at[P_S:P_S + M1, P_S:P_S + M2].set(p["w_m2"])
    b3 = z((N_t2,)).at[:S].set(p["b_e2"]).at[P_S:P_S + M2].set(p["b_m2"])
    b3 = b3.at[P_S + M2].set(1.0)       # constant-1 lane that carries b_m3

    # editor final Linear (no bias), lane-dense output
    w_e3 = z((P_S, P_S)).at[:S, :S].set(p["w_e3"])

    # bias slab (8, Wb) f32; row 4 = magnitude VPU head [w_m3 | b_m3 at lane M2]
    Wb = max(P_S, N_f, N_t1, N_t2, P_M2)
    bias = jnp.zeros((8, Wb), f32)
    bias = bias.at[0, :P_S].set(b0)
    bias = bias.at[1, :N_f].set(b1)
    bias = bias.at[2, :N_t1].set(b2)
    bias = bias.at[3, :N_t2].set(b3)
    bias = bias.at[4, :M2].set(p["w_m3"].reshape(M2).astype(f32))
    bias = bias.at[4, M2].set(p["b_m3"].reshape(()).astype(f32))

    wd = weight_dtype
    meta = dict(S=S, T=T, P_S=P_S, P_in=P_in)
    return {"w_se0": w_se0.astype(wd), "w_big": w_big.astype(wd),
            "w_t1": w_t1.astype(wd), "w_t2": w_t2.astype(wd),
            "w_e3": w_e3.astype(wd), "bias": bias, "meta": meta}


# --------------------- deterministic parameter setup ------------------------ #
def _linear_params(key, fan_in, fan_out, bias=True):
    kw, kb = jax.random.split(key)
    bound = 1.0 / jnp.sqrt(jnp.float32(fan_in))
    w = jax.random.uniform(kw, (fan_in, fan_out), jnp.float32, -bound, bound)
    b = (jax.random.uniform(kb, (fan_out,), jnp.float32, -bound, bound)
         if bias else None)
    return w, b


def _bn_params(key, dim):
    k1, k2, k3, k4 = jax.random.split(key, 4)
    gamma = 1.0 + 0.1 * jax.random.normal(k1, (dim,), jnp.float32)
    beta = 0.1 * jax.random.normal(k2, (dim,), jnp.float32)
    mean = 0.1 * jax.random.normal(k3, (dim,), jnp.float32)
    var = jnp.abs(1.0 + 0.1 * jax.random.normal(k4, (dim,), jnp.float32))
    return gamma, beta, mean, var


def _fold_bn(w, b, bn):
    """Fold eval-mode BatchNorm1d into the preceding Linear (exact)."""
    gamma, beta, mean, var = bn
    scale = gamma / jnp.sqrt(var + BN_EPS)
    b0 = b if b is not None else 0.0
    return w * scale[None, :], (b0 - mean) * scale + beta


def build_params(key, shape_latent_dim, text_embed_dim, bottleneck_dim=256):
    S, T = shape_latent_dim, text_embed_dim
    in_dim = S + T
    keys = iter(jax.random.split(key, 32))
    p = {}

    # shape_encoder = MLP(S, [S, S], b_norm=True, dropout=0.2)
    w, b = _linear_params(next(keys), S, S)
    p["w_se0"], p["b_se0"] = _fold_bn(w, b, _bn_params(next(keys), S))
    p["w_se1"], p["b_se1"] = _linear_params(next(keys), S, S)

    # editor = MLP(in_dim, [bottleneck, S, S, S], b_norm=True, remove_final_bias=True)
    w, b = _linear_params(next(keys), in_dim, bottleneck_dim)
    p["w_e0"], p["b_e0"] = _fold_bn(w, b, _bn_params(next(keys), bottleneck_dim))
    w, b = _linear_params(next(keys), bottleneck_dim, S)
    p["w_e1"], p["b_e1"] = _fold_bn(w, b, _bn_params(next(keys), S))
    w, b = _linear_params(next(keys), S, S)
    p["w_e2"], p["b_e2"] = _fold_bn(w, b, _bn_params(next(keys), S))
    p["w_e3"], _ = _linear_params(next(keys), S, S, bias=False)

    # mag_mlp = MLP(in_dim, [256, 128, 64, 1], b_norm=True, closure=ReLU())
    w, b = _linear_params(next(keys), in_dim, 256)
    p["w_m0"], p["b_m0"] = _fold_bn(w, b, _bn_params(next(keys), 256))
    w, b = _linear_params(next(keys), 256, 128)
    p["w_m1"], p["b_m1"] = _fold_bn(w, b, _bn_params(next(keys), 128))
    w, b = _linear_params(next(keys), 128, 64)
    p["w_m2"], p["b_m2"] = _fold_bn(w, b, _bn_params(next(keys), 64))
    p["w_m3"], p["b_m3"] = _linear_params(next(keys), 64, 1)
    return p


# ----------------------------- pure-JAX reference ---------------------------- #
def reference(x_a, emb, p):
    """Eval-mode PyTorch module semantics (BN folded), true f32 matmuls."""
    hp = jax.lax.Precision.HIGHEST
    relu = lambda v: jnp.maximum(v, 0.0)

    def lin(x, w, b=None):
        y = jnp.dot(x, w, precision=hp, preferred_element_type=jnp.float32)
        return y if b is None else y + b

    h = relu(lin(x_a, p["w_se0"], p["b_se0"]))
    shape_fts = lin(h, p["w_se1"], p["b_se1"])
    x = jnp.concatenate([shape_fts, emb], axis=1)

    e = relu(lin(x, p["w_e0"], p["b_e0"]))
    e = relu(lin(e, p["w_e1"], p["b_e1"]))
    e = relu(lin(e, p["w_e2"], p["b_e2"]))
    e = lin(e, p["w_e3"])
    e = e / jnp.maximum(jnp.linalg.norm(e, axis=1, keepdims=True), NORM_EPS)

    m = relu(lin(x, p["w_m0"], p["b_m0"]))
    m = relu(lin(m, p["w_m1"], p["b_m1"]))
    m = relu(lin(m, p["w_m2"], p["b_m2"]))
    m = relu(lin(m, p["w_m3"], p["b_m3"]))
    return e * m


if __name__ == "__main__":
    B, S, T = 4, 32, 32  # batch, shape_latent_dim, text_embed_dim

    key = jax.random.PRNGKey(0)
    k_x, k_e, k_p = jax.random.split(key, 3)
    x_a = jax.random.normal(k_x, (B, S), jnp.float32)
    embed_ab = jax.random.normal(k_e, (B, T), jnp.float32)
    params = build_params(k_p, S, T, bottleneck_dim=256)

    ref = reference(x_a, embed_ab, params)

    # 1) f32 "exact" mode (matches eval-mode PyTorch numerics; small reassociation
    #    error from the host-side linear folds is covered by the tolerance)
    packed_f32 = pack_params(params, weight_dtype=jnp.float32)
    out = jax.block_until_ready(
        mlp_latent_mapper_bottlenecked(x_a, embed_ab, packed_f32))
    assert out.shape == (B, S), out.shape
    assert jnp.allclose(out, ref, atol=1e-4, rtol=1e-4), "f32 mismatch vs reference"

    # 2) bf16-operand / f32-accumulate production mode vs the f32 reference
    packed_bf16 = pack_params(params, weight_dtype=jnp.bfloat16)
    out_bf = jax.block_until_ready(
        mlp_latent_mapper_bottlenecked(x_a, embed_ab, packed_bf16))
    assert jnp.allclose(out_bf, ref, atol=3e-2, rtol=3e-2), "bf16 mismatch"

    # 3) batched production path: block_b=256 (fills 256-row MXU), 2 blocks
    #    (even block count so v7x's two TensorCores both get work)
    Bb = 512
    xb = jax.random.normal(jax.random.PRNGKey(1), (Bb, S), jnp.float32)
    eb = jax.random.normal(jax.random.PRNGKey(2), (Bb, T), jnp.float32)
    out_b = jax.block_until_ready(
        mlp_latent_mapper_bottlenecked(xb, eb, packed_bf16, block_b=256))
    ref_b = reference(xb, eb, params)
    assert out_b.shape == (Bb, S), out_b.shape
    assert jnp.allclose(out_b, ref_b, atol=3e-2, rtol=3e-2), "batched mismatch"

    # 4) non-divisible batch: zero-padded gridded path (no whole-array fallback)
    Bc = 300
    out_c = jax.block_until_ready(
        mlp_latent_mapper_bottlenecked(xb[:Bc], eb[:Bc], packed_bf16, block_b=256))
    assert out_c.shape == (Bc, S), out_c.shape
    assert jnp.allclose(out_c, ref_b[:Bc], atol=3e-2, rtol=3e-2), "padded-batch mismatch"

    print("KERNEL_OK")
</pallas_src>

<mosaic_0001>
module attributes {stable_mosaic.version = 11 : i64} {
  func.func @_mapper_kernel(%arg0: memref<4x128xf32, #tpu.memory_space<vmem>>, %arg1: memref<128x128xf32, #tpu.memory_space<vmem>>, %arg2: memref<256x512xf32, #tpu.memory_space<vmem>>, %arg3: memref<512x256xf32, #tpu.memory_space<vmem>>, %arg4: memref<256x256xf32, #tpu.memory_space<vmem>>, %arg5: memref<128x128xf32, #tpu.memory_space<vmem>>, %arg6: memref<8x512xf32, #tpu.memory_space<vmem>>, %arg7: memref<4x128xf32, #tpu.memory_space<vmem>>) attributes {dimension_semantics = [], scalar_prefetch = 0 : i64, scratch_operands = 0 : i64, tpu.core_type = #tpu.core_type<tc>} {
    %c0 = arith.constant 0 : index
    %c0_0 = arith.constant 0 : index
    %0 = vector.load %arg0[%c0, %c0_0] : memref<4x128xf32, #tpu.memory_space<vmem>>, vector<4x128xf32>
    %c0_1 = arith.constant 0 : index
    %c0_2 = arith.constant 0 : index
    %1 = vector.load %arg1[%c0_1, %c0_2] : memref<128x128xf32, #tpu.memory_space<vmem>>, vector<128x128xf32>
    %cst = arith.constant dense<0.000000e+00> : vector<4x128xf32>
    %2 = tpu.matmul %0, %1, %cst {dimension_numbers = #tpu.dot_dimension_numbers<[1], [0], [0], [1], [0, 0, 1, 1], [], []>} : vector<4x128xf32>, vector<128x128xf32>, vector<4x128xf32> -> vector<4x128xf32>
    %c0_3 = arith.constant 0 : index
    %c0_4 = arith.constant 0 : index
    %3 = vector.load %arg6[%c0_3, %c0_4] : memref<8x512xf32, #tpu.memory_space<vmem>>, vector<1x128xf32>
    %4 = vector.broadcast %3 : vector<1x128xf32> to vector<4x128xf32>
    %5 = arith.addf %2, %4 : vector<4x128xf32>
    %cst_5 = arith.constant 0.000000e+00 : f32
    %6 = vector.broadcast %cst_5 : f32 to vector<4x128xf32>
    %7 = arith.maximumf %5, %6 : vector<4x128xf32>
    %8 = tpu.concatenate %7, %0 in 1 : vector<4x128xf32>, vector<4x128xf32> -> vector<4x256xf32>
    %c0_6 = arith.constant 0 : index
    %c0_7 = arith.constant 0 : index
    %9 = vector.load %arg2[%c0_6, %c0_7] : memref<256x512xf32, #tpu.memory_space<vmem>>, vector<256x512xf32>
    %cst_8 = arith.constant dense<0.000000e+00> : vector<4x512xf32>
    %10 = tpu.matmul %8, %9, %cst_8 {dimension_numbers = #tpu.dot_dimension_numbers<[1], [0], [0], [1], [0, 0, 1, 1], [], []>} : vector<4x256xf32>, vector<256x512xf32>, vector<4x512xf32> -> vector<4x512xf32>
    %c1 = arith.constant 1 : index
    %c0_9 = arith.constant 0 : index
    %11 = vector.load %arg6[%c1, %c0_9] : memref<8x512xf32, #tpu.memory_space<vmem>>, vector<1x512xf32>
    %12 = vector.broadcast %11 : vector<1x512xf32> to vector<4x512xf32>
    %13 = arith.addf %10, %12 : vector<4x512xf32>
    %cst_10 = arith.constant 0.000000e+00 : f32
    %14 = vector.broadcast %cst_10 : f32 to vector<4x512xf32>
    %15 = arith.maximumf %13, %14 : vector<4x512xf32>
    %c0_11 = arith.constant 0 : index
    %c0_12 = arith.constant 0 : index
    %16 = vector.load %arg3[%c0_11, %c0_12] : memref<512x256xf32, #tpu.memory_space<vmem>>, vector<512x256xf32>
    %cst_13 = arith.constant dense<0.000000e+00> : vector<4x256xf32>
    %17 = tpu.matmul %15, %16, %cst_13 {dimension_numbers = #tpu.dot_dimension_numbers<[1], [0], [0], [1], [0, 0, 1, 1], [], []>} : vector<4x512xf32>, vector<512x256xf32>, vector<4x256xf32> -> vector<4x256xf32>
    %c2 = arith.constant 2 : index
    %c0_14 = arith.constant 0 : index
    %18 = vector.load %arg6[%c2, %c0_14] : memref<8x512xf32, #tpu.memory_space<vmem>>, vector<1x256xf32>
    %19 = vector.broadcast %18 : vector<1x256xf32> to vector<4x256xf32>
    %20 = arith.addf %17, %19 : vector<4x256xf32>
    %cst_15 = arith.constant 0.000000e+00 : f32
    %21 = vector.broadcast %cst_15 : f32 to vector<4x256xf32>
    %22 = arith.maximumf %20, %21 : vector<4x256xf32>
    %c0_16 = arith.constant 0 : index
    %c0_17 = arith.constant 0 : index
    %23 = vector.load %arg4[%c0_16, %c0_17] : memref<256x256xf32, #tpu.memory_space<vmem>>, vector<256x256xf32>
    %cst_18 = arith.constant dense<0.000000e+00> : vector<4x256xf32>
    %24 = tpu.matmul %22, %23, %cst_18 {dimension_numbers = #tpu.dot_dimension_numbers<[1], [0], [0], [1], [0, 0, 1, 1], [], []>} : vector<4x256xf32>, vector<256x256xf32>, vector<4x256xf32> -> vector<4x256xf32>
    %c3 = arith.constant 3 : index
    %c0_19 = arith.constant 0 : index
    %25 = vector.load %arg6[%c3, %c0_19] : memref<8x512xf32, #tpu.memory_space<vmem>>, vector<1x256xf32>
    %26 = vector.broadcast %25 : vector<1x256xf32> to vector<4x256xf32>
    %27 = arith.addf %24, %26 : vector<4x256xf32>
    %cst_20 = arith.constant 0.000000e+00 : f32
    %28 = vector.broadcast %cst_20 : f32 to vector<4x256xf32>
    %29 = arith.maximumf %27, %28 : vector<4x256xf32>
    %30 = vector.extract_strided_slice %29 {offsets = [0, 0], sizes = [4, 128], strides = [1, 1]} : vector<4x256xf32> to vector<4x128xf32>
    %c0_21 = arith.constant 0 : index
    %c0_22 = arith.constant 0 : index
    %31 = vector.load %arg5[%c0_21, %c0_22] : memref<128x128xf32, #tpu.memory_space<vmem>>, vector<128x128xf32>
    %cst_23 = arith.constant dense<0.000000e+00> : vector<4x128xf32>
    %32 = tpu.matmul %30, %31, %cst_23 {dimension_numbers = #tpu.dot_dimension_numbers<[1], [0], [0], [1], [0, 0, 1, 1], [], []>} : vector<4x128xf32>, vector<128x128xf32>, vector<4x128xf32> -> vector<4x128xf32>
    %33 = arith.mulf %32, %32 : vector<4x128xf32>
    %cst_24 = arith.constant dense<0.000000e+00> : vector<4xf32>
    %34 = vector.multi_reduction <add>, %33, %cst_24 [1] : vector<4x128xf32> to vector<4xf32>
    %35 = vector.shape_cast %34 : vector<4xf32> to vector<4x1xf32>
    %cst_25 = arith.constant 1.000000e-24 : f32
    %36 = vector.broadcast %cst_25 : f32 to vector<4x1xf32>
    %37 = arith.maximumf %35, %36 : vector<4x1xf32>
    %38 = math.rsqrt %37 : vector<4x1xf32>
    %39 = vector.broadcast %38 : vector<4x1xf32> to vector<4x128xf32>
    %40 = arith.mulf %32, %39 : vector<4x128xf32>
    %41 = vector.extract_strided_slice %29 {offsets = [0, 128], sizes = [4, 128], strides = [1, 1]} : vector<4x256xf32> to vector<4x128xf32>
    %c4 = arith.constant 4 : index
    %c0_26 = arith.constant 0 : index
    %42 = vector.load %arg6[%c4, %c0_26] : memref<8x512xf32, #tpu.memory_space<vmem>>, vector<1x128xf32>
    %43 = vector.broadcast %42 : vector<1x128xf32> to vector<4x128xf32>
    %44 = arith.mulf %41, %43 : vector<4x128xf32>
    %cst_27 = arith.constant dense<0.000000e+00> : vector<4xf32>
    %45 = vector.multi_reduction <add>, %44, %cst_27 [1] : vector<4x128xf32> to vector<4xf32>
    %46 = vector.shape_cast %45 : vector<4xf32> to vector<4x1xf32>
    %cst_28 = arith.constant 0.000000e+00 : f32
    %47 = vector.broadcast %cst_28 : f32 to vector<4x1xf32>
    %48 = arith.maximumf %46, %47 : vector<4x1xf32>
    %49 = vector.broadcast %48 : vector<4x1xf32> to vector<4x128xf32>
    %50 = arith.mulf %40, %49 : vector<4x128xf32>
    %c0_29 = arith.constant 0 : index
    %c0_30 = arith.constant 0 : index
    %51 = vector.load %arg7[%c0_29, %c0_30] : memref<4x128xf32, #tpu.memory_space<vmem>>, vector<4x128xf32>
    tpu.vector_store %arg7[%c0_29, %c0_30], %50 {strides = array<i32>} : memref<4x128xf32, #tpu.memory_space<vmem>>, vector<4x128xf32>,
    return
  }
}

</mosaic_0001>

<bundles_post_ra>
// kernel: tpu_custom_call.1
= control target key start
LH: loop header
LB: loop body
LE: loop exit
PB: predicated region body
PF: predicated region fallthrough
CT: control target
= control target key end

     0   :  { %12 = vsyncpa [#allocation3], 0  ;;  %s1955_s0 = inlined_call_operand.hbm [shape: f32[4,128], index: 0, kind: input, shape index: {}]   ;;  %s1956_s1 = inlined_call_operand.hbm [shape: f32[128,128], index: 1, kind: input, shape index: {}]   ;;  %s1957_s2 = inlined_call_operand.hbm [shape: f32[256,512], index: 2, kind: input, shape index: {}]   ;;  %s1958_s3 = inlined_call_operand.hbm [shape: f32[512,256], index: 3, kind: input, shape index: {}]   ;;  %s1959_s4 = inlined_call_operand.hbm [shape: f32[256,256], index: 4, kind: input, shape index: {}]   ;;  %s1960_s5 = inlined_call_operand.hbm [shape: f32[128,128], index: 5, kind: input, shape index: {}]   ;;  %s1961_s6 = inlined_call_operand.hbm [shape: f32[8,512], index: 6, kind: input, shape index: {}]   ;;  %s1962_s7 = inlined_call_operand.hbm [shape: f32[4,128], index: 7, kind: output, shape index: {}]  }
   0x1   :  { %13 = vsyncpa [#allocation6], 0 }
   0x2   :  { %14 = vsyncpa [#allocation9], 0 }
   0x3   :  { %15 = vsyncpa [#allocation12], 0 }
   0x4   :  { %16 = vsyncpa [#allocation4], 0  ;;  %s1740_s24 = smov [#allocation5]   ;;  %s1554_s28 = scalar_lea.hbm %s1956_s1, 2048 }
   0x5   :  { %s32_s25 = sshll.u32 %s1740_s24, 4  ;;  %p1555_p0 = scmp.ne.s32.totalorder %s1956_s1, %s1554_s28  ;;  %s33_s25 = int_to_ptr.vmem [resolvable:$true] %s32_s25 }
   0x6   :  { %p1558_p1 = scmp.lt.u32.totalorder %s1554_s28, %s1956_s1 }
   0x8   :  { %p1560_p2 = pnand %p1558_p1, %p1555_p0 }
   0xa   :  { %1563 = shalt.err (!%p1560_p2)
}
   0xb   :  { %s1564_s10 = scalar_lea.vmem %s33_s25, 2048  ;;  %p1569_p4 = scmp.lt.s32.totalorder %s33_s25, %s33_s25 }
   0xc   :  { %p1565_p3 = scmp.ne.s32.totalorder %s33_s25, %s1564_s10  ;;  %p1570_p5 = scmp.lt.s32.totalorder %s1564_s10, %s1564_s10 }
   0xe   :  { %p1571_p6 = por %p1570_p5, %p1569_p4 }
  0x10   :  { %p1572_p7 = pnand %p1571_p6, %p1565_p3 }
  0x12   :  { %1575 = shalt.err (!%p1572_p7)
}
  0x13   :  { %s1741_s11 = smov 128   ;;  %s1742_s12 = smov 8  }
  0x14   :  { %38 = dma.hbm_to_vmem [thread:$0]  %s1956_s1, 2048, %s33_s25, [#allocation6], %s1741_s11, %s1741_s11, %s1742_s12  }
  0x15   :  { %s1743_s15 = smov [#allocation8]   ;;  %s1576_s19 = scalar_lea.hbm %s1958_s3, 16384 }
  0x16   :  { %s56_s16 = sshll.u32 %s1743_s15, 4  ;;  %p1577_p8 = scmp.ne.s32.totalorder %s1958_s3, %s1576_s19  ;;  %s57_s16 = int_to_ptr.vmem [resolvable:$true] %s56_s16 }
  0x17   :  { %p1580_p9 = scmp.lt.u32.totalorder %s1576_s19, %s1958_s3 }
  0x19   :  { %p1582_p10 = pnand %p1580_p9, %p1577_p8 }
  0x1b   :  { %1585 = shalt.err (!%p1582_p10)
}
  0x1c   :  { %s1586_s24 = scalar_lea.vmem %s57_s16, 16384  ;;  %p1591_p12 = scmp.lt.s32.totalorder %s57_s16, %s57_s16 }
  0x1d   :  { %p1587_p11 = scmp.ne.s32.totalorder %s57_s16, %s1586_s24  ;;  %p1592_p13 = scmp.lt.s32.totalorder %s1586_s24, %s1586_s24 }
  0x1f   :  { %p1593_p0 = por %p1592_p13, %p1591_p12 }
  0x21   :  { %p1594_p1 = pnand %p1593_p0, %p1587_p11 }
  0x23   :  { %1597 = shalt.err (!%p1594_p1)
}
  0x24   :  { %s1744_s1 = smov 256   ;;  %s1745_s25 = smov 16  }
  0x25   :  { %62 = dma.hbm_to_vmem [thread:$0]  %s1958_s3, 16384, %s57_s16, [#allocation9], %s1744_s1, %s1744_s1, %s1745_s25  }
  0x26   :  { %s1746_s28 = smov [#allocation11]   ;;  %s1747_s30 = smov [#allocation2]  }
  0x27   :  { %s80_s29 = sshll.u32 %s1746_s28, 4  ;;  %s23_s8 = sshll.u32 %s1747_s30, 4  ;;  %s81_s29 = int_to_ptr.vmem [resolvable:$true] %s80_s29  ;;  %s24_s8 = int_to_ptr.vmem [resolvable:$true] %s23_s8 }
  0x28   :  { %s1598_s13 = scalar_lea.hbm %s1960_s5, 2048 }
  0x29   :  { %p1599_p2 = scmp.ne.s32.totalorder %s1960_s5, %s1598_s13  ;;  %p1602_p3 = scmp.lt.u32.totalorder %s1598_s13, %s1960_s5 }
  0x2b   :  { %p1604_p4 = pnand %p1602_p3, %p1599_p2 }
  0x2d   :  { %1607 = shalt.err (!%p1604_p4)
}
  0x2e   :  { %s1608_s3 = scalar_lea.vmem %s81_s29, 2048  ;;  %p1613_p6 = scmp.lt.s32.totalorder %s81_s29, %s81_s29 }
  0x2f   :  { %p1609_p5 = scmp.ne.s32.totalorder %s81_s29, %s1608_s3  ;;  %p1614_p7 = scmp.lt.s32.totalorder %s1608_s3, %s1608_s3 }
  0x31   :  { %p1615_p8 = por %p1614_p7, %p1613_p6 }
  0x33   :  { %p1616_p9 = pnand %p1615_p8, %p1609_p5 }
  0x35   :  { %1619 = shalt.err (!%p1616_p9)
}
  0x36   :  { %86 = dma.hbm_to_vmem [thread:$0]  %s1960_s5, 2048, %s81_s29, [#allocation12], %s1741_s11, %s1741_s11, %s1742_s12  }
  0x37   :  { %s1620_s22 = scalar_lea.hbm %s1955_s0, 64 }
  0x38   :  { %p1621_p10 = scmp.ne.s32.totalorder %s1955_s0, %s1620_s22  ;;  %p1624_p11 = scmp.lt.u32.totalorder %s1620_s22, %s1955_s0 }
  0x3a   :  { %p1626_p12 = pnand %p1624_p11, %p1621_p10 }
  0x3c   :  { %1629 = shalt.err (!%p1626_p12)
}
  0x3d   :  { %s1630_s28 = scalar_lea.vmem %s24_s8, 64  ;;  %p1635_p0 = scmp.lt.s32.totalorder %s24_s8, %s24_s8 }
  0x3e   :  { %p1631_p13 = scmp.ne.s32.totalorder %s24_s8, %s1630_s28  ;;  %p1636_p1 = scmp.lt.s32.totalorder %s1630_s28, %s1630_s28 }
  0x40   :  { %p1637_p2 = por %p1636_p1, %p1635_p0 }
  0x42   :  { %p1638_p3 = pnand %p1637_p2, %p1631_p13 }
  0x44   :  { %1641 = shalt.err (!%p1638_p3)
}
  0x45   :  { %26 = dma.hbm_to_vmem [thread:$0]  %s1955_s0, 64, %s24_s8, [#allocation3]  }
  0x46   :  { %s1748_s12 = smov [#allocation7]   ;;  %s1642_s10 = scalar_lea.hbm %s1957_s2, 16384 }
  0x47   :  { %s44_s29 = sshll.u32 %s1748_s12, 4  ;;  %p1643_p4 = scmp.ne.s32.totalorder %s1957_s2, %s1642_s10  ;;  %s45_s29 = int_to_ptr.vmem [resolvable:$true] %s44_s29 }
  0x48   :  { %p1646_p5 = scmp.lt.u32.totalorder %s1642_s10, %s1957_s2 }
  0x4a   :  { %p1648_p6 = pnand %p1646_p5, %p1643_p4 }
  0x4c   :  { %1651 = shalt.err (!%p1648_p6)
}
  0x4d   :  { %s1652_s18 = scalar_lea.vmem %s45_s29, 16384  ;;  %p1657_p8 = scmp.lt.s32.totalorder %s45_s29, %s45_s29 }
  0x4e   :  { %p1653_p7 = scmp.ne.s32.totalorder %s45_s29, %s1652_s18  ;;  %p1658_p9 = scmp.lt.s32.totalorder %s1652_s18, %s1652_s18 }
  0x50   :  { %p1659_p10 = por %p1658_p9, %p1657_p8 }
  0x52   :  { %p1660_p11 = pnand %p1659_p10, %p1653_p7 }
  0x54   :  { %1663 = shalt.err (!%p1660_p11)
}
  0x55   :  { %s1749_s0 = smov 512   ;;  %s1750_s8 = smov 32  }
  0x56   :  { %50 = dma.hbm_to_vmem [thread:$0]  %s1957_s2, 16384, %s45_s29, [#allocation6], %s1749_s0, %s1749_s0, %s1750_s8  }
  0x57   :  { %s1751_s19 = smov [#allocation10]   ;;  %s1752_s21 = smov [#allocation13]  }
  0x58   :  { %s68_s20 = sshll.u32 %s1751_s19, 4  ;;  %s93_s22 = sshll.u32 %s1752_s21, 4  ;;  %s69_s20 = int_to_ptr.vmem [resolvable:$true] %s68_s20  ;;  %s94_s22 = int_to_ptr.vmem [resolvable:$true] %s93_s22 }
  0x59   :  { %s1664_s26 = scalar_lea.hbm %s1959_s4, 8192 }
  0x5a   :  { %p1665_p12 = scmp.ne.s32.totalorder %s1959_s4, %s1664_s26  ;;  %p1668_p13 = scmp.lt.u32.totalorder %s1664_s26, %s1959_s4 }
  0x5c   :  { %p1670_p0 = pnand %p1668_p13, %p1665_p12 }
  0x5e   :  { %1673 = shalt.err (!%p1670_p0)
}
  0x5f   :  { %s1674_s2 = scalar_lea.vmem %s69_s20, 8192  ;;  %p1679_p2 = scmp.lt.s32.totalorder %s69_s20, %s69_s20 }
  0x60   :  { %p1675_p1 = scmp.ne.s32.totalorder %s69_s20, %s1674_s2  ;;  %p1680_p3 = scmp.lt.s32.totalorder %s1674_s2, %s1674_s2 }
  0x62   :  { %p1681_p4 = por %p1680_p3, %p1679_p2 }
  0x64   :  { %p1682_p5 = pnand %p1681_p4, %p1675_p1 }
  0x66   :  { %1685 = shalt.err (!%p1682_p5)
}
  0x67   :  { %74 = dma.hbm_to_vmem [thread:$0]  %s1959_s4, 8192, %s69_s20, [#allocation9], %s1744_s1, %s1744_s1, %s1745_s25  }
  0x68   :  { %s1686_s10 = scalar_lea.hbm %s1961_s6, 512 }
  0x69   :  { %p1687_p6 = scmp.ne.s32.totalorder %s1961_s6, %s1686_s10  ;;  %p1690_p7 = scmp.lt.u32.totalorder %s1686_s10, %s1961_s6 }
  0x6b   :  { %p1692_p8 = pnand %p1690_p7, %p1687_p6 }
  0x6d   :  { %1695 = shalt.err (!%p1692_p8)
}
  0x6e   :  { %s1696_s18 = scalar_lea.vmem %s94_s22, 512  ;;  %p1701_p10 = scmp.lt.s32.totalorder %s94_s22, %s94_s22 }
  0x6f   :  { %p1697_p9 = scmp.ne.s32.totalorder %s94_s22, %s1696_s18  ;;  %p1702_p11 = scmp.lt.s32.totalorder %s1696_s18, %s1696_s18 }
  0x71   :  { %p1703_p12 = por %p1702_p11, %p1701_p10 }
  0x73   :  { %p1704_p13 = pnand %p1703_p12, %p1697_p9 }
  0x75   :  { %1707 = shalt.err (!%p1704_p13)
}
  0x76   :  { %96 = dma.hbm_to_vmem [thread:$0]  %s1961_s6, 512, %s94_s22, [#allocation12]  }
  0x77   :  { %1730 = dma.done.wait [#allocation3], 64  }
  0x78   :  { %1731 = vsyncadd [#allocation3], 4294967232 }
  0x79   :  { %1732 = dma.done.wait [#allocation6], 18432  }
  0x7a   :  { %1733 = vsyncadd [#allocation6], 4294948864 }
  0x7b   :  { %1734 = dma.done.wait [#allocation9], 24576  }
  0x7c   :  { %1735 = vsyncadd [#allocation9], 4294942720 }
  0x7d   :  { %1736 = dma.done.wait [#allocation12], 2560  }
  0x7e   :  { %1737 = vsyncadd [#allocation12], 4294964736  ;;  %v1753_v0 = vmov 0.0|0.0   ;;  %vm1754_vm0 = vmmov 0   ;;  %v1755_v1 = vmov 0.0   ;;  %v119_v2 = vld [vmem:[#allocation5] sm:$0xff] }
  0x7f   :  { %1163 = vmatprep.subr.bf16.mxu0 %v1753_v0  ;;  %1125 = vmatprep.mubr.msk.f32.mxu0 %vm1754_vm0, %v1755_v1  ;;  %v120_v3 = vld [vmem:[#allocation5 + $0x8] sm:$0xff]  ;;  %v121_v4 = vld [vmem:[#allocation5 + $0x10] sm:$0xff]  ;;  %v122_v6 = vld [vmem:[#allocation5 + $0x18] sm:$0xff]  ;;  %vm1026_vm1 = vcmask 1043456   ;;  %s1756_s6 = smov [#allocation14]  }
  0x80   :  { %v1164_v5 = vpack.c.bf16 %v120_v3, %v119_v2  ;;  %v1167_v7 = vpack.c.bf16 %v122_v6, %v121_v4  ;;  %v123_v8 = vld [vmem:[#allocation5 + $0x20] sm:$0xff]  ;;  %v124_v9 = vld [vmem:[#allocation5 + $0x28] sm:$0xff]  ;;  %v1897_v10 = vld [vmem:[#allocation2] sm:$0xf]  ;;  %s1047_s25 = sshll.u32 %s1756_s6, 4  ;;  %s1048_s25 = int_to_ptr.vmem [resolvable:$true] %s1047_s25 }
  0x81   :  { %v208_v11 = vld [vmem:[#allocation7 + $0x8] sm:$0xff]  ;;  %422 = vmatprep.mubr.f32.mxu1 %v1897_v10  ;;  %v1170_v13 = vpack.c.bf16 %v124_v9, %v123_v8  ;;  %v125_v14 = vld [vmem:[#allocation5 + $0x30] sm:$0xff]  ;;  %v207_v16 = vld [vmem:[#allocation7] sm:$0xff]  ;;  %s1708_s0 = scalar_lea.vmem %s1048_s25, 64  ;;  %p1713_p1 = scmp.lt.s32.totalorder %s1048_s25, %s1048_s25 }
  0x82   :  { %1165 = vmatpush3.bf16.msra.mxu0 %v1164_v5  ;;  %v212_v12 = vld [vmem:[#allocation7 + $0x28] sm:$0xff]  ;;  %v211_v17 = vld [vmem:[#allocation7 + $0x20] sm:$0xff]  ;;  %v126_v18 = vld [vmem:[#allocation5 + $0x38] sm:$0xff]  ;;  %p1709_p0 = scmp.ne.s32.totalorder %s1048_s25, %s1708_s0  ;;  %p1714_p2 = scmp.lt.s32.totalorder %s1708_s0, %s1708_s0 }
  0x83   :  { %1166 = vmatprep.subr.bf16.mxu0 %v1753_v0  ;;  %v1187_v15 = vpack.c.bf16 %v212_v12, %v208_v11  ;;  %v1189_v19 = vpack.c.bf16 %v211_v17, %v207_v16  ;;  %v216_v20 = vld [vmem:[#allocation7 + $0x48] sm:$0xff]  ;;  %v215_v23 = vld [vmem:[#allocation7 + $0x40] sm:$0xff]  ;;  %v1173_v25 = vpack.c.bf16 %v126_v18, %v125_v14  ;;  %v129_v38 = vld [vmem:[#allocation5 + $0x50] sm:$0xff] }
  0x84   :  { %v220_v21 = vld [vmem:[#allocation7 + $0x68] sm:$0xff]  ;;  %v219_v24 = vld [vmem:[#allocation7 + $0x60] sm:$0xff]  ;;  %v130_v42 = vld [vmem:[#allocation5 + $0x58] sm:$0xff]  ;;  %p1715_p3 = por %p1714_p2, %p1713_p1 }
  0x85   :  { %1188 = vmatprep.subr.bf16.mxu1 %v1187_v15  ;;  %v1191_v22 = vpack.c.bf16 %v220_v21, %v216_v20  ;;  %v127_v26 = vld [vmem:[#allocation5 + $0x40] sm:$0xff]  ;;  %v1193_v27 = vpack.c.bf16 %v219_v24, %v215_v23  ;;  %v224_v28 = vld [vmem:[#allocation7 + $0x88] sm:$0xff]  ;;  %v1179_v46 = vpack.c.bf16 %v130_v42, %v129_v38  ;;  %v133_v56 = vld [vmem:[#allocation5 + $0x70] sm:$0xff] }
  0x86   :  { %1168 = vmatpush3.bf16.msra.mxu0 %v1167_v7  ;;  %1190 = vmatpush1.bf16.msra.mxu1 %v1189_v19  ;;  %v228_v29 = vld [vmem:[#allocation7 + $0xa8] sm:$0xff]  ;;  %v223_v32 = vld [vmem:[#allocation7 + $0x80] sm:$0xff]  ;;  %v134_v60 = vld [vmem:[#allocation5 + $0x78] sm:$0xff]  ;;  %p1716_p4 = pnand %p1715_p3, %p1709_p0 }
  0x87   :  { %1169 = vmatprep.subr.bf16.mxu0 %v1753_v0  ;;  %1192 = vmatprep.subr.bf16.mxu1 %v1191_v22  ;;  %v128_v30 = vld [vmem:[#allocation5 + $0x48] sm:$0xff]  ;;  %v1195_v31 = vpack.c.bf16 %v228_v29, %v224_v28  ;;  %v227_v33 = vld [vmem:[#allocation7 + $0xa0] sm:$0xff]  ;;  %v210_v63 = vld [vmem:[#allocation7 + $0x18] sm:$0xff]  ;;  %v1185_v4 = vpack.c.bf16 %v134_v60, %v133_v56 }
  0x88   :  { %v232_v34 = vld [vmem:[#allocation7 + $0xc8] sm:$0xff]  ;;  %v1197_v35 = vpack.c.bf16 %v227_v33, %v223_v32  ;;  %v1176_v37 = vpack.c.bf16 %v128_v30, %v127_v26  ;;  %v231_v40 = vld [vmem:[#allocation7 + $0xc0] sm:$0xff]  ;;  %v214_v2 = vld [vmem:[#allocation7 + $0x38] sm:$0xff] }
  0x89   :  { %v236_v36 = vld [vmem:[#allocation7 + $0xe8] sm:$0xff]  ;;  %v235_v41 = vld [vmem:[#allocation7 + $0xe0] sm:$0xff]  ;;  %v209_v5 = vld [vmem:[#allocation7 + $0x10] sm:$0xff]  ;;  %v1251_v9 = vpack.c.bf16 %v214_v2, %v210_v63 }
  0x8a   :  { %1171 = vmatpush3.bf16.msra.mxu0 %v1170_v13  ;;  %1194 = vmatpush1.bf16.msra.mxu1 %v1193_v27  ;;  %v1199_v39 = vpack.c.bf16 %v236_v36, %v232_v34  ;;  %v240_v43 = vld [vmem:[#allocation7 + $0x108] sm:$0xff]  ;;  %v1201_v45 = vpack.c.bf16 %v235_v41, %v231_v40  ;;  %v131_v47 = vld [vmem:[#allocation5 + $0x60] sm:$0xff]  ;;  %v213_v11 = vld [vmem:[#allocation7 + $0x30] sm:$0xff] }
  0x8b   :  { %1172 = vmatprep.subr.bf16.mxu0 %v1753_v0  ;;  %1196 = vmatprep.subr.bf16.mxu1 %v1195_v31  ;;  %v244_v44 = vld [vmem:[#allocation7 + $0x128] sm:$0xff]  ;;  %v239_v49 = vld [vmem:[#allocation7 + $0x100] sm:$0xff]  ;;  %v218_v14 = vld [vmem:[#allocation7 + $0x58] sm:$0xff]  ;;  %v1253_v17 = vpack.c.bf16 %v213_v11, %v209_v5 }
  0x8c   :  { %v1203_v48 = vpack.c.bf16 %v244_v44, %v240_v43  ;;  %v243_v50 = vld [vmem:[#allocation7 + $0x120] sm:$0xff]  ;;  %v132_v51 = vld [vmem:[#allocation5 + $0x68] sm:$0xff]  ;;  %v222_v15 = vld [vmem:[#allocation7 + $0x78] sm:$0xff] }
  0x8d   :  { %v248_v52 = vld [vmem:[#allocation7 + $0x148] sm:$0xff]  ;;  %v1205_v54 = vpack.c.bf16 %v243_v50, %v239_v49  ;;  %v1182_v55 = vpack.c.bf16 %v132_v51, %v131_v47  ;;  %v247_v58 = vld [vmem:[#allocation7 + $0x140] sm:$0xff]  ;;  %v217_v18 = vld [vmem:[#allocation7 + $0x50] sm:$0xff]  ;;  %v1255_v22 = vpack.c.bf16 %v222_v15, %v218_v14 }
  0x8e   :  { %1174 = vmatpush3.bf16.msra.mxu0 %v1173_v25  ;;  %1198 = vmatpush1.bf16.msra.mxu1 %v1197_v35  ;;  %v252_v53 = vld [vmem:[#allocation7 + $0x168] sm:$0xff]  ;;  %v251_v59 = vld [vmem:[#allocation7 + $0x160] sm:$0xff]  ;;  %v221_v23 = vld [vmem:[#allocation7 + $0x70] sm:$0xff] }
  0x8f   :  { %1175 = vmatprep.subr.bf16.mxu0 %v1753_v0  ;;  %1200 = vmatprep.subr.bf16.mxu1 %v1199_v39  ;;  %v1207_v57 = vpack.c.bf16 %v252_v53, %v248_v52  ;;  %v256_v61 = vld [vmem:[#allocation7 + $0x188] sm:$0xff]  ;;  %v1209_v3 = vpack.c.bf16 %v251_v59, %v247_v58  ;;  %v255_v7 = vld [vmem:[#allocation7 + $0x180] sm:$0xff]  ;;  %v226_v26 = vld [vmem:[#allocation7 + $0x98] sm:$0xff]  ;;  %v1257_v29 = vpack.c.bf16 %v221_v23, %v217_v18 }
  0x90   :  { %v260_v62 = vld [vmem:[#allocation7 + $0x1a8] sm:$0xff]  ;;  %v259_v8 = vld [vmem:[#allocation7 + $0x1a0] sm:$0xff]  ;;  %v230_v27 = vld [vmem:[#allocation7 + $0xb8] sm:$0xff] }
  0x91   :  { %v1211_v6 = vpack.c.bf16 %v260_v62, %v256_v61  ;;  %v264_v12 = vld [vmem:[#allocation7 + $0x1c8] sm:$0xff]  ;;  %v1213_v16 = vpack.c.bf16 %v259_v8, %v255_v7  ;;  %v263_v20 = vld [vmem:[#allocation7 + $0x1c0] sm:$0xff]  ;;  %v225_v30 = vld [vmem:[#allocation7 + $0x90] sm:$0xff]  ;;  %v1259_v34 = vpack.c.bf16 %v230_v27, %v226_v26 }
  0x92   :  { %1177 = vmatpush3.bf16.msra.mxu0 %v1176_v37  ;;  %1202 = vmatpush1.bf16.msra.mxu1 %v1201_v45  ;;  %v268_v13 = vld [vmem:[#allocation7 + $0x1e8] sm:$0xff]  ;;  %v267_v21 = vld [vmem:[#allocation7 + $0x1e0] sm:$0xff]  ;;  %v229_v35 = vld [vmem:[#allocation7 + $0xb0] sm:$0xff] }
  0x93   :  { %1178 = vmatprep.subr.bf16.mxu0 %v1753_v0  ;;  %1204 = vmatprep.subr.bf16.mxu1 %v1203_v48  ;;  %v1215_v19 = vpack.c.bf16 %v268_v13, %v264_v12  ;;  %v272_v24 = vld [vmem:[#allocation7 + $0x208] sm:$0xff]  ;;  %v1217_v28 = vpack.c.bf16 %v267_v21, %v263_v20  ;;  %v271_v32 = vld [vmem:[#allocation7 + $0x200] sm:$0xff]  ;;  %v234_v38 = vld [vmem:[#allocation7 + $0xd8] sm:$0xff]  ;;  %v1261_v41 = vpack.c.bf16 %v229_v35, %v225_v30 }
  0x94   :  { %v276_v25 = vld [vmem:[#allocation7 + $0x228] sm:$0xff]  ;;  %v275_v33 = vld [vmem:[#allocation7 + $0x220] sm:$0xff]  ;;  %v238_v39 = vld [vmem:[#allocation7 + $0xf8] sm:$0xff] }
  0x95   :  { %v1219_v31 = vpack.c.bf16 %v276_v25, %v272_v24  ;;  %v280_v36 = vld [vmem:[#allocation7 + $0x248] sm:$0xff]  ;;  %v1221_v40 = vpack.c.bf16 %v275_v33, %v271_v32  ;;  %v233_v42 = vld [vmem:[#allocation7 + $0xd0] sm:$0xff]  ;;  %v279_v44 = vld [vmem:[#allocation7 + $0x240] sm:$0xff] }
  0x96   :  { %1180 = vmatpush3.bf16.msra.mxu0 %v1179_v46  ;;  %1206 = vmatpush1.bf16.msra.mxu1 %v1205_v54  ;;  %v284_v37 = vld [vmem:[#allocation7 + $0x268] sm:$0xff]  ;;  %v283_v45 = vld [vmem:[#allocation7 + $0x260] sm:$0xff]  ;;  %v1263_v46 = vpack.c.bf16 %v238_v39, %v234_v38  ;;  %v237_v47 = vld [vmem:[#allocation7 + $0xf0] sm:$0xff] }
  0x97   :  { %1181 = vmatprep.subr.bf16.mxu0 %v1753_v0  ;;  %1208 = vmatprep.subr.bf16.mxu1 %v1207_v57  ;;  %v1223_v43 = vpack.c.bf16 %v284_v37, %v280_v36  ;;  %v288_v48 = vld [vmem:[#allocation7 + $0x288] sm:$0xff]  ;;  %v242_v50 = vld [vmem:[#allocation7 + $0x118] sm:$0xff]  ;;  %v1265_v52 = vpack.c.bf16 %v237_v47, %v233_v42  ;;  %v241_v53 = vld [vmem:[#allocation7 + $0x110] sm:$0xff] }
  0x98   :  { %v292_v49 = vld [vmem:[#allocation7 + $0x2a8] sm:$0xff]  ;;  %v246_v51 = vld [vmem:[#allocation7 + $0x138] sm:$0xff]  ;;  %v291_v56 = vld [vmem:[#allocation7 + $0x2a0] sm:$0xff] }
  0x99   :  { %v1227_v54 = vpack.c.bf16 %v292_v49, %v288_v48  ;;  %v1267_v57 = vpack.c.bf16 %v246_v51, %v242_v50  ;;  %v245_v58 = vld [vmem:[#allocation7 + $0x130] sm:$0xff]  ;;  %v296_v59 = vld [vmem:[#allocation7 + $0x2c8] sm:$0xff]  ;;  %v250_v61 = vld [vmem:[#allocation7 + $0x158] sm:$0xff] }
  0x9a   :  { %1183 = vmatpush3.bf16.msra.mxu0 %v1182_v55  ;;  %1210 = vmatpush1.bf16.msra.mxu1 %v1209_v3  ;;  %v287_v55 = vld [vmem:[#allocation7 + $0x280] sm:$0xff]  ;;  %v300_v60 = vld [vmem:[#allocation7 + $0x2e8] sm:$0xff]  ;;  %v254_v62 = vld [vmem:[#allocation7 + $0x178] sm:$0xff]  ;;  %v1269_v2 = vpack.c.bf16 %v245_v58, %v241_v53 }
  0x9b   :  { %1184 = vmatprep.subr.bf16.mxu0 %v1753_v0  ;;  %1212 = vmatprep.subr.bf16.mxu1 %v1211_v6  ;;  %v1229_v63 = vpack.c.bf16 %v291_v56, %v287_v55  ;;  %v249_v3 = vld [vmem:[#allocation7 + $0x150] sm:$0xff]  ;;  %v295_v5 = vld [vmem:[#allocation7 + $0x2c0] sm:$0xff]  ;;  %v1271_v7 = vpack.c.bf16 %v254_v62, %v250_v61  ;;  %v308_v11 = vld [vmem:[#allocation7 + $0x328] sm:$0xff] }
  0x9c   :  { %v299_v6 = vld [vmem:[#allocation7 + $0x2e0] sm:$0xff]  ;;  %v253_v8 = vld [vmem:[#allocation7 + $0x170] sm:$0xff]  ;;  %v258_v12 = vld [vmem:[#allocation7 + $0x198] sm:$0xff] }
  0x9d   :  { %v262_v13 = vld [vmem:[#allocation7 + $0x1b8] sm:$0xff]  ;;  %v1233_v14 = vpack.c.bf16 %v299_v6, %v295_v5  ;;  %v1273_v15 = vpack.c.bf16 %v253_v8, %v249_v3  ;;  %v303_v18 = vld [vmem:[#allocation7 + $0x300] sm:$0xff]  ;;  %v261_v21 = vld [vmem:[#allocation7 + $0x1b0] sm:$0xff] }
  0x9e   :  { %1186 = vmatpush3.bf16.msra.mxu0 %v1185_v4  ;;  %1214 = vmatpush1.bf16.msra.mxu1 %v1213_v16  ;;  %v1231_v4 = vpack.c.bf16 %v300_v60, %v296_v59  ;;  %v257_v16 = vld [vmem:[#allocation7 + $0x190] sm:$0xff]  ;;  %v1275_v20 = vpack.c.bf16 %v262_v13, %v258_v12  ;;  %v316_v23 = vld [vmem:[#allocation7 + $0x368] sm:$0xff]  ;;  %v266_v24 = vld [vmem:[#allocation7 + $0x1d8] sm:$0xff] }
  0x9f   :  { %1252 = vmatprep.subr.bf16.mxu0 %v1251_v9  ;;  %1216 = vmatprep.subr.bf16.mxu1 %v1215_v19  ;;  %v304_v9 = vld [vmem:[#allocation7 + $0x308] sm:$0xff]  ;;  %v307_v19 = vld [vmem:[#allocation7 + $0x320] sm:$0xff]  ;;  %v270_v25 = vld [vmem:[#allocation7 + $0x1f8] sm:$0xff]  ;;  %v1277_v27 = vpack.c.bf16 %v261_v21, %v257_v16 }
  0xa0   :  { %v1237_v26 = vpack.c.bf16 %v307_v19, %v303_v18  ;;  %v311_v30 = vld [vmem:[#allocation7 + $0x340] sm:$0xff]  ;;  %v1279_v32 = vpack.c.bf16 %v270_v25, %v266_v24  ;;  %v269_v33 = vld [vmem:[#allocation7 + $0x1f0] sm:$0xff]  ;;  %v324_v35 = vld [vmem:[#allocation7 + $0x3a8] sm:$0xff] }
  0xa1   :  { %1126 = vmatmul.mubr.f32.vlgmr.msra.gmra.mrb[0].mxu0 %v1897_v10  ;;  %v274_v36 = vld [vmem:[#allocation7 + $0x218] sm:$0xff]  ;;  %v323_v42 = vld [vmem:[#allocation7 + $0x3a0] sm:$0xff]  ;;  %v281_v51 = vld [vmem:[#allocation7 + $0x250] sm:$0xff] }
  0xa2   :  { %1254 = vmatpush1.bf16.msra.mxu0 %v1253_v17  ;;  %493 = vmatprep.mubr.f32.mxu0 %v1897_v10  ;;  %v1225_v10 = vpack.c.bf16 %v283_v45, %v279_v44  ;;  %v1235_v17 = vpack.c.bf16 %v308_v11, %v304_v9  ;;  %v278_v37 = vld [vmem:[#allocation7 + $0x238] sm:$0xff]  ;;  %v273_v44 = vld [vmem:[#allocation7 + $0x210] sm:$0xff] }
  0xa3   :  { %1256 = vmatprep.subr.bf16.mxu0 %v1255_v22  ;;  %1218 = vmatpush1.bf16.msra.mxu1 %v1217_v28  ;;  %v312_v22 = vld [vmem:[#allocation7 + $0x348] sm:$0xff]  ;;  %v265_v28 = vld [vmem:[#allocation7 + $0x1d0] sm:$0xff]  ;;  %v286_v47 = vld [vmem:[#allocation7 + $0x278] sm:$0xff] }
  0xa4   :  { %1220 = vmatprep.subr.bf16.mxu1 %v1219_v31  ;;  %v315_v31 = vld [vmem:[#allocation7 + $0x360] sm:$0xff]  ;;  %v1281_v39 = vpack.c.bf16 %v269_v33, %v265_v28  ;;  %v277_v45 = vld [vmem:[#allocation7 + $0x230] sm:$0xff]  ;;  %v294_v53 = vld [vmem:[#allocation7 + $0x2b8] sm:$0xff] }
  0xa5   :  { %v1241_v38 = vpack.c.bf16 %v315_v31, %v311_v30  ;;  %v1285_v49 = vpack.c.bf16 %v277_v45, %v273_v44  ;;  %v289_v56 = vld [vmem:[#allocation7 + $0x290] sm:$0xff]  ;;  %v298_v58 = vld [vmem:[#allocation7 + $0x2d8] sm:$0xff]  ;;  %v331_v28 = vld [vmem:[#allocation7 + $0x3e0] sm:$0xff] }
  0xa6   :  { %1258 = vmatpush1.bf16.msra.mxu0 %v1257_v29  ;;  %v1239_v29 = vpack.c.bf16 %v316_v23, %v312_v22  ;;  %v302_v59 = vld [vmem:[#allocation7 + $0x2f8] sm:$0xff]  ;;  %v297_v62 = vld [vmem:[#allocation7 + $0x2d0] sm:$0xff]  ;;  %v328_v22 = vld [vmem:[#allocation7 + $0x3c8] sm:$0xff] }
  0xa7   :  { %1260 = vmatprep.subr.bf16.mxu0 %v1259_v34  ;;  %1222 = vmatpush1.bf16.msra.mxu1 %v1221_v40  ;;  %v320_v34 = vld [vmem:[#allocation7 + $0x388] sm:$0xff]  ;;  %v1295_v61 = vpack.c.bf16 %v302_v59, %v298_v58  ;;  %v310_v3 = vld [vmem:[#allocation7 + $0x338] sm:$0xff]  ;;  %v305_v6 = vld [vmem:[#allocation7 + $0x310] sm:$0xff] }
  0xa8   :  { %1224 = vmatprep.subr.bf16.mxu1 %v1223_v43  ;;  %v1243_v40 = vpack.c.bf16 %v324_v35, %v320_v34  ;;  %v1283_v43 = vpack.c.bf16 %v278_v37, %v274_v36  ;;  %v314_v8 = vld [vmem:[#allocation7 + $0x358] sm:$0xff]  ;;  %v313_v13 = vld [vmem:[#allocation7 + $0x350] sm:$0xff]  ;;  %v332_v23 = vld [vmem:[#allocation7 + $0x3e8] sm:$0xff] }
  0xa9   :  { %v318_v9 = vld [vmem:[#allocation7 + $0x378] sm:$0xff]  ;;  %v321_v19 = vld [vmem:[#allocation7 + $0x390] sm:$0xff]  ;;  %v1247_v25 = vpack.c.bf16 %v332_v23, %v328_v22  ;;  %v505_v34 = vld [vmem:[#allocation8 + $0x8] sm:$0xff] }
  0xaa   :  { %1262 = vmatpush1.bf16.msra.mxu0 %v1261_v41  ;;  %v319_v41 = vld [vmem:[#allocation7 + $0x380] sm:$0xff]  ;;  %v1303_v12 = vpack.c.bf16 %v318_v9, %v314_v8  ;;  %v326_v16 = vld [vmem:[#allocation7 + $0x3b8] sm:$0xff]  ;;  %v329_v31 = vld [vmem:[#allocation7 + $0x3d0] sm:$0xff] }
  0xab   :  { %1264 = vmatprep.subr.bf16.mxu0 %v1263_v46  ;;  %1226 = vmatpush1.bf16.msra.mxu1 %v1225_v10  ;;  %v282_v46 = vld [vmem:[#allocation7 + $0x258] sm:$0xff]  ;;  %v1245_v48 = vpack.c.bf16 %v323_v42, %v319_v41  ;;  %v285_v10 = vld [vmem:[#allocation7 + $0x270] sm:$0xff]  ;;  %v135_v37 = vld [vmem:[#allocation13] ss:$0 sm:$0xff] }
  0xac   :  { %1228 = vmatprep.subr.bf16.mxu1 %v1227_v54  ;;  %v1287_v50 = vpack.c.bf16 %v286_v47, %v282_v46  ;;  %v1289_v54 = vpack.c.bf16 %v285_v10, %v281_v51  ;;  %v330_v24 = vld [vmem:[#allocation7 + $0x3d8] sm:$0xff]  ;;  %v509_v41 = vld [vmem:[#allocation8 + $0x28] sm:$0xff]  ;;  %v516_v59 = vld [vmem:[#allocation8 + $0x60] sm:$0xff] }
  0xad   :  { %v507_v35 = vld [vmem:[#allocation8 + $0x18] sm:$0xff]  ;;  %v524_v9 = vld [vmem:[#allocation8 + $0xa0] sm:$0xff]  ;;  %v534_v23 = vld [vmem:[#allocation8 + $0xf0] sm:$0xff] }
  0xae   :  { %1266 = vmatpush1.bf16.msra.mxu0 %v1265_v52  ;;  %v290_v52 = vld [vmem:[#allocation7 + $0x298] sm:$0xff]  ;;  %v1315_v36 = vpack.c.bf16 %v507_v35, %v505_v34  ;;  %v532_v22 = vld [vmem:[#allocation8 + $0xe0] sm:$0xff]  ;;  %v542_v35 = vld [vmem:[#allocation8 + $0x130] sm:$0xff] }
  0xaf   :  { %1268 = vmatprep.subr.bf16.mxu0 %v1267_v57  ;;  %1230 = vmatpush1.bf16.msra.mxu1 %v1229_v63  ;;  %v1291_v55 = vpack.c.bf16 %v294_v53, %v290_v52  ;;  %v293_v57 = vld [vmem:[#allocation7 + $0x2b0] sm:$0xff]  ;;  %v511_v42 = vld [vmem:[#allocation8 + $0x38] sm:$0xff]  ;;  %v512_v53 = vld [vmem:[#allocation8 + $0x40] sm:$0xff] }
  0xb0   :  { %1232 = vmatprep.subr.bf16.mxu1 %v1231_v4  ;;  %v1293_v60 = vpack.c.bf16 %v293_v57, %v289_v56  ;;  %v301_v63 = vld [vmem:[#allocation7 + $0x2f0] sm:$0xff]  ;;  %v1319_v47 = vpack.c.bf16 %v511_v42, %v509_v41  ;;  %v515_v51 = vld [vmem:[#allocation8 + $0x58] sm:$0xff]  ;;  %v540_v34 = vld [vmem:[#allocation8 + $0x120] sm:$0xff] }
  0xb1   :  { %v1297_v4 = vpack.c.bf16 %v301_v63, %v297_v62  ;;  %v519_v56 = vld [vmem:[#allocation8 + $0x78] sm:$0xff]  ;;  %v546_v41 = vld [vmem:[#allocation8 + $0x150] sm:$0xff]  ;;  %v549_v42 = vld [vmem:[#allocation8 + $0x168] sm:$0xff] }
  0xb2   :  { %1270 = vmatpush1.bf16.msra.mxu0 %v1269_v2  ;;  %v306_v2 = vld [vmem:[#allocation7 + $0x318] sm:$0xff] }
  0xb3   :  { %1272 = vmatprep.subr.bf16.mxu0 %v1271_v7  ;;  %1234 = vmatpush1.bf16.msra.mxu1 %v1233_v14  ;;  %v1299_v5 = vpack.c.bf16 %v310_v3, %v306_v2  ;;  %v309_v7 = vld [vmem:[#allocation7 + $0x330] sm:$0xff]  ;;  %v523_v62 = vld [vmem:[#allocation8 + $0x98] sm:$0xff]  ;;  %v520_v3 = vld [vmem:[#allocation8 + $0x80] sm:$0xff] }
  0xb4   :  { %1236 = vmatprep.subr.bf16.mxu1 %v1235_v17  ;;  %v1301_v11 = vpack.c.bf16 %v309_v7, %v305_v6  ;;  %v317_v14 = vld [vmem:[#allocation7 + $0x370] sm:$0xff]  ;;  %v527_v6 = vld [vmem:[#allocation8 + $0xb8] sm:$0xff] }
  0xb5   :  { %v1305_v17 = vpack.c.bf16 %v317_v14, %v313_v13  ;;  %v531_v13 = vld [vmem:[#allocation8 + $0xd8] sm:$0xff] }
  0xb6   :  { %1274 = vmatpush1.bf16.msra.mxu0 %v1273_v15  ;;  %v322_v15 = vld [vmem:[#allocation7 + $0x398] sm:$0xff] }
  0xb7   :  { %1276 = vmatprep.subr.bf16.mxu0 %v1275_v20  ;;  %1238 = vmatpush1.bf16.msra.mxu1 %v1237_v26  ;;  %v1307_v18 = vpack.c.bf16 %v326_v16, %v322_v15  ;;  %v325_v20 = vld [vmem:[#allocation7 + $0x3b0] sm:$0xff]  ;;  %v334_v26 = vld [vmem:[#allocation7 + $0x3f8] sm:$0xff]  ;;  %v528_v16 = vld [vmem:[#allocation8 + $0xc0] sm:$0xff] }
  0xb8   :  { %1240 = vmatprep.subr.bf16.mxu1 %v1239_v29  ;;  %v1309_v21 = vpack.c.bf16 %v325_v20, %v321_v19  ;;  %v1311_v29 = vpack.c.bf16 %v334_v26, %v330_v24  ;;  %v535_v19 = vld [vmem:[#allocation8 + $0xf8] sm:$0xff]  ;;  %v537_v24 = vld [vmem:[#allocation8 + $0x108] sm:$0xff]  ;;  %v1345_v26 = vpack.c.bf16 %v534_v23, %v532_v22  ;;  %v793_v23 = vld [vmem:[#allocation10 + $0x20] sm:$0xff] }
  0xba   :  { %1278 = vmatpush1.bf16.msra.mxu0 %v1277_v27  ;;  %v327_v27 = vld [vmem:[#allocation7 + $0x3c0] sm:$0xff] }
  0xbb   :  { %1280 = vmatprep.subr.bf16.mxu0 %v1279_v32  ;;  %1242 = vmatpush1.bf16.msra.mxu1 %v1241_v38  ;;  %v1249_v30 = vpack.c.bf16 %v331_v28, %v327_v27  ;;  %v333_v32 = vld [vmem:[#allocation7 + $0x3f0] sm:$0xff]  ;;  %v504_v38 = vld [vmem:[#allocation8] sm:$0xff] }
  0xbc   :  { %1244 = vmatprep.subr.bf16.mxu1 %v1243_v40  ;;  %v1313_v33 = vpack.c.bf16 %v333_v32, %v329_v31  ;;  %v536_v28 = vld [vmem:[#allocation8 + $0x100] sm:$0xff]  ;;  %v543_v31 = vld [vmem:[#allocation8 + $0x138] sm:$0xff] }
  0xbe   :  { %1282 = vmatpush1.bf16.msra.mxu0 %v1281_v39  ;;  %v506_v39 = vld [vmem:[#allocation8 + $0x10] sm:$0xff] }
  0xbf   :  { %1284 = vmatprep.subr.bf16.mxu0 %v1283_v43  ;;  %1246 = vmatpush1.bf16.msra.mxu1 %v1245_v48  ;;  %v1317_v45 = vpack.c.bf16 %v506_v39, %v504_v38  ;;  %v508_v48 = vld [vmem:[#allocation8 + $0x20] sm:$0xff]  ;;  %v1353_v38 = vpack.c.bf16 %v542_v35, %v540_v34 }
  0xc0   :  { %1248 = vmatprep.subr.bf16.mxu1 %v1247_v25  ;;  %v539_v25 = vld [vmem:[#allocation8 + $0x118] sm:$0xff]  ;;  %v801_v35 = vld [vmem:[#allocation10 + $0x60] sm:$0xff] }
  0xc1   :  { %v1347_v27 = vpack.c.bf16 %v539_v25, %v537_v24  ;;  %v795_v24 = vld [vmem:[#allocation10 + $0x30] sm:$0xff]  ;;  %v798_v25 = vld [vmem:[#allocation10 + $0x48] sm:$0xff] }
  0xc2   :  { %1286 = vmatpush1.bf16.msra.mxu0 %v1285_v49  ;;  %v510_v49 = vld [vmem:[#allocation8 + $0x30] sm:$0xff] }
  0xc3   :  { %1288 = vmatprep.subr.bf16.mxu0 %v1287_v50  ;;  %1250 = vmatpush1.bf16.msra.mxu1 %v1249_v30  ;;  %v513_v50 = vld [vmem:[#allocation8 + $0x48] sm:$0xff]  ;;  %v1321_v10 = vpack.c.bf16 %v510_v49, %v508_v48  ;;  %v555_v49 = vld [vmem:[#allocation8 + $0x198] sm:$0xff] }
  0xc4   :  { %1316 = vmatprep.subr.bf16.mxu1 %v1315_v36  ;;  %v1323_v52 = vpack.c.bf16 %v515_v51, %v513_v50  ;;  %v541_v30 = vld [vmem:[#allocation8 + $0x128] sm:$0xff] }
  0xc5   :  { %v545_v36 = vld [vmem:[#allocation8 + $0x148] sm:$0xff] }
  0xc6   :  { %1290 = vmatpush1.bf16.msra.mxu0 %v1289_v54  ;;  %v514_v54 = vld [vmem:[#allocation8 + $0x50] sm:$0xff]  ;;  %v553_v48 = vld [vmem:[#allocation8 + $0x188] sm:$0xff] }
  0xc7   :  { %1292 = vmatprep.subr.bf16.mxu0 %v1291_v55  ;;  %v517_v55 = vld [vmem:[#allocation8 + $0x68] sm:$0xff]  ;;  %v1325_v57 = vpack.c.bf16 %v514_v54, %v512_v53  ;;  %v1363_v51 = vpack.c.bf16 %v555_v49, %v553_v48  ;;  %v559_v54 = vld [vmem:[#allocation8 + $0x1b8] sm:$0xff]  ;;  %v811_v48 = vld [vmem:[#allocation10 + $0xb0] sm:$0xff] }
  0xc8   :  { %v1327_v58 = vpack.c.bf16 %v519_v56, %v517_v55  ;;  %v557_v53 = vld [vmem:[#allocation8 + $0x1a8] sm:$0xff] }
  0xc9   :  { %v1367_v56 = vpack.c.bf16 %v559_v54, %v557_v53  ;;  %v814_v49 = vld [vmem:[#allocation10 + $0xc8] sm:$0xff]  ;;  %v815_v53 = vld [vmem:[#allocation10 + $0xd0] sm:$0xff] }
  0xca   :  { %1294 = vmatpush1.bf16.msra.mxu0 %v1293_v60  ;;  %v518_v60 = vld [vmem:[#allocation8 + $0x70] sm:$0xff]  ;;  %v818_v54 = vld [vmem:[#allocation10 + $0xe8] sm:$0xff] }
  0xcb   :  { %1296 = vmatprep.subr.bf16.mxu0 %v1295_v61  ;;  %v521_v61 = vld [vmem:[#allocation8 + $0x88] sm:$0xff]  ;;  %v1329_v63 = vpack.c.bf16 %v518_v60, %v516_v59  ;;  %v563_v60 = vld [vmem:[#allocation8 + $0x1d8] sm:$0xff] }
  0xcc   :  { %v1331_v2 = vpack.c.bf16 %v523_v62, %v521_v61  ;;  %v561_v59 = vld [vmem:[#allocation8 + $0x1c8] sm:$0xff] }
  0xcd   :  { %v1371_v62 = vpack.c.bf16 %v563_v60, %v561_v59  ;;  %v819_v59 = vld [vmem:[#allocation10 + $0xf0] sm:$0xff]  ;;  %v822_v60 = vld [vmem:[#allocation10 + $0x108] sm:$0xff] }
  0xce   :  { %1298 = vmatpush1.bf16.msra.mxu0 %v1297_v4  ;;  %v522_v4 = vld [vmem:[#allocation8 + $0x90] sm:$0xff] }
  0xcf   :  { %1300 = vmatprep.subr.bf16.mxu0 %v1299_v5  ;;  %v525_v5 = vld [vmem:[#allocation8 + $0xa8] sm:$0xff]  ;;  %v1333_v7 = vpack.c.bf16 %v522_v4, %v520_v3 }
  0xd0   :  { %v1335_v8 = vpack.c.bf16 %v527_v6, %v525_v5  ;;  %v565_v4 = vld [vmem:[#allocation8 + $0x1e8] sm:$0xff]  ;;  %v567_v5 = vld [vmem:[#allocation8 + $0x1f8] sm:$0xff] }
  0xd1   :  { %v1375_v6 = vpack.c.bf16 %v567_v5, %v565_v4  ;;  %v826_v4 = vld [vmem:[#allocation10 + $0x128] sm:$0xff]  ;;  %v828_v5 = vld [vmem:[#allocation10 + $0x138] sm:$0xff] }
  0xd2   :  { %1302 = vmatpush1.bf16.msra.mxu0 %v1301_v11  ;;  %v526_v11 = vld [vmem:[#allocation8 + $0xb0] sm:$0xff] }
  0xd3   :  { %1304 = vmatprep.subr.bf16.mxu0 %v1303_v12  ;;  %v529_v12 = vld [vmem:[#allocation8 + $0xc8] sm:$0xff]  ;;  %v1337_v14 = vpack.c.bf16 %v526_v11, %v524_v9 }
  0xd4   :  { %v1339_v15 = vpack.c.bf16 %v531_v13, %v529_v12  ;;  %v569_v11 = vld [vmem:[#allocation8 + $0x208] sm:$0xff]  ;;  %v571_v12 = vld [vmem:[#allocation8 + $0x218] sm:$0xff] }
  0xd5   :  { %v1379_v13 = vpack.c.bf16 %v571_v12, %v569_v11  ;;  %v830_v11 = vld [vmem:[#allocation10 + $0x148] sm:$0xff]  ;;  %v832_v12 = vld [vmem:[#allocation10 + $0x158] sm:$0xff] }
  0xd6   :  { %1306 = vmatpush1.bf16.msra.mxu0 %v1305_v17  ;;  %v530_v17 = vld [vmem:[#allocation8 + $0xd0] sm:$0xff] }
  0xd7   :  { %1308 = vmatprep.subr.bf16.mxu0 %v1307_v18  ;;  %v533_v18 = vld [vmem:[#allocation8 + $0xe8] sm:$0xff]  ;;  %v1341_v20 = vpack.c.bf16 %v530_v17, %v528_v16  ;;  %v789_v16 = vld [vmem:[#allocation10] sm:$0xff] }
  0xda   :  { %1310 = vmatpush1.bf16.msra.mxu0 %v1309_v21  ;;  %v1343_v21 = vpack.c.bf16 %v535_v19, %v533_v18  ;;  %v791_v18 = vld [vmem:[#allocation10 + $0x10] sm:$0xff]  ;;  %v794_v19 = vld [vmem:[#allocation10 + $0x28] sm:$0xff] }
  0xdb   :  { %1312 = vmatprep.subr.bf16.mxu0 %v1311_v29  ;;  %v538_v29 = vld [vmem:[#allocation8 + $0x110] sm:$0xff] }
  0xdc   :  { %v1349_v32 = vpack.c.bf16 %v538_v29, %v536_v28  ;;  %v797_v29 = vld [vmem:[#allocation10 + $0x40] sm:$0xff] }
  0xde   :  { %1314 = vmatpush1.bf16.msra.mxu0 %v1313_v33  ;;  %v1351_v33 = vpack.c.bf16 %v543_v31, %v541_v30  ;;  %v799_v30 = vld [vmem:[#allocation10 + $0x50] sm:$0xff]  ;;  %v802_v31 = vld [vmem:[#allocation10 + $0x68] sm:$0xff] }
 0x174   :  { %v202_v40 = vpop.f32.mrb[0].mxu0 }
 0x175   :  { %v203_v43 = vadd.f32 %v202_v40, %v135_v37  ;;  %v1127_v44 = vpop.f32.mrb[1].mxu0  ;;  %v547_v37 = vld [vmem:[#allocation8 + $0x158] sm:$0xff]  ;;  %v544_v40 = vld [vmem:[#allocation8 + $0x140] sm:$0xff] }
 0x176   :  { %v1355_v39 = vpack.c.bf16 %v547_v37, %v545_v36  ;;  %v1357_v44 = vpack.c.bf16 %v546_v41, %v544_v40  ;;  %v803_v36 = vld [vmem:[#allocation10 + $0x70] sm:$0xff]  ;;  %v806_v37 = vld [vmem:[#allocation10 + $0x88] sm:$0xff]  ;;  %v805_v41 = vld [vmem:[#allocation10 + $0x80] sm:$0xff] }
 0x177   :  { %v206_v46 = vmax.f32 %v203_v43, 0.0  ;;  %v551_v43 = vld [vmem:[#allocation8 + $0x178] sm:$0xff] }
 0x179   :  { %423 = vmatmul.mubr.f32.vlgmr.msra.gmra.mrb[0].mxu1 %v206_v46  ;;  %494 = vmatmul.mubr.f32.vlgmr.msra.gmra.mrb[2].mxu0 %v206_v46  ;;  %v548_v46 = vld [vmem:[#allocation8 + $0x160] sm:$0xff] }
 0x17a   :  { %1318 = vmatpush1.bf16.msra.mxu1 %v1317_v45  ;;  %v1359_v45 = vpack.c.bf16 %v551_v43, %v549_v42  ;;  %v807_v42 = vld [vmem:[#allocation10 + $0x90] sm:$0xff]  ;;  %v810_v43 = vld [vmem:[#allocation10 + $0xa8] sm:$0xff] }
 0x17b   :  { %1320 = vmatprep.subr.bf16.mxu1 %v1319_v47  ;;  %v550_v47 = vld [vmem:[#allocation8 + $0x170] sm:$0xff] }
 0x17c   :  { %v1361_v50 = vpack.c.bf16 %v550_v47, %v548_v46  ;;  %v809_v47 = vld [vmem:[#allocation10 + $0xa0] sm:$0xff] }
 0x17e   :  { %1322 = vmatpush1.bf16.msra.mxu1 %v1321_v10  ;;  %v552_v10 = vld [vmem:[#allocation8 + $0x180] sm:$0xff] }
 0x17f   :  { %1324 = vmatprep.subr.bf16.mxu1 %v1323_v52  ;;  %v554_v52 = vld [vmem:[#allocation8 + $0x190] sm:$0xff] }
 0x180   :  { %v1365_v55 = vpack.c.bf16 %v554_v52, %v552_v10  ;;  %v813_v52 = vld [vmem:[#allocation10 + $0xc0] sm:$0xff] }
 0x182   :  { %1326 = vmatpush1.bf16.msra.mxu1 %v1325_v57  ;;  %v556_v57 = vld [vmem:[#allocation8 + $0x1a0] sm:$0xff] }
 0x183   :  { %1328 = vmatprep.subr.bf16.mxu1 %v1327_v58  ;;  %v558_v58 = vld [vmem:[#allocation8 + $0x1b0] sm:$0xff] }
 0x184   :  { %v1369_v61 = vpack.c.bf16 %v558_v58, %v556_v57  ;;  %v817_v58 = vld [vmem:[#allocation10 + $0xe0] sm:$0xff] }
 0x186   :  { %1330 = vmatpush1.bf16.msra.mxu1 %v1329_v63  ;;  %v560_v63 = vld [vmem:[#allocation8 + $0x1c0] sm:$0xff] }
 0x187   :  { %1332 = vmatprep.subr.bf16.mxu1 %v1331_v2  ;;  %v562_v2 = vld [vmem:[#allocation8 + $0x1d0] sm:$0xff] }
 0x188   :  { %v1373_v3 = vpack.c.bf16 %v562_v2, %v560_v63  ;;  %v821_v2 = vld [vmem:[#allocation10 + $0x100] sm:$0xff] }
 0x18a   :  { %1334 = vmatpush1.bf16.msra.mxu1 %v1333_v7  ;;  %v564_v7 = vld [vmem:[#allocation8 + $0x1e0] sm:$0xff] }
 0x18b   :  { %1336 = vmatprep.subr.bf16.mxu1 %v1335_v8  ;;  %v566_v8 = vld [vmem:[#allocation8 + $0x1f0] sm:$0xff] }
 0x18c   :  { %v1377_v9 = vpack.c.bf16 %v566_v8, %v564_v7  ;;  %v1479_v7 = vpack.c.bf16 %v828_v5, %v826_v4  ;;  %v825_v8 = vld [vmem:[#allocation10 + $0x120] sm:$0xff]  ;;  %v579_v4 = vld [vmem:[#allocation8 + $0x258] sm:$0xff] }
 0x18e   :  { %1338 = vmatpush1.bf16.msra.mxu1 %v1337_v14  ;;  %v790_v14 = vld [vmem:[#allocation10 + $0x8] sm:$0xff] }
 0x18f   :  { %1340 = vmatprep.subr.bf16.mxu1 %v1339_v15  ;;  %v792_v15 = vld [vmem:[#allocation10 + $0x18] sm:$0xff] }
 0x190   :  { %v1443_v17 = vpack.c.bf16 %v792_v15, %v790_v14  ;;  %v1483_v14 = vpack.c.bf16 %v832_v12, %v830_v11  ;;  %v829_v15 = vld [vmem:[#allocation10 + $0x140] sm:$0xff]  ;;  %v583_v11 = vld [vmem:[#allocation8 + $0x278] sm:$0xff] }
 0x192   :  { %1342 = vmatpush1.bf16.msra.mxu1 %v1341_v20  ;;  %v796_v20 = vld [vmem:[#allocation10 + $0x38] sm:$0xff]  ;;  %1444 = vmatprep.subr.bf16.mxu0 %v1443_v17  ;;  %v834_v17 = vld [vmem:[#allocation10 + $0x168] sm:$0xff] }
 0x193   :  { %1344 = vmatprep.subr.bf16.mxu1 %v1343_v21  ;;  %v1445_v21 = vpack.c.bf16 %v791_v18, %v789_v16  ;;  %v1447_v22 = vpack.c.bf16 %v796_v20, %v794_v19  ;;  %v831_v16 = vld [vmem:[#allocation10 + $0x150] sm:$0xff]  ;;  %v836_v18 = vld [vmem:[#allocation10 + $0x178] sm:$0xff] }
 0x194   :  { %v1485_v19 = vpack.c.bf16 %v831_v16, %v829_v15  ;;  %v1487_v20 = vpack.c.bf16 %v836_v18, %v834_v17  ;;  %v582_v15 = vld [vmem:[#allocation8 + $0x270] sm:$0xff]  ;;  %v585_v16 = vld [vmem:[#allocation8 + $0x288] sm:$0xff]  ;;  %v587_v17 = vld [vmem:[#allocation8 + $0x298] sm:$0xff] }
 0x195   :  { %1446 = vmatpush1.bf16.msra.mxu0 %v1445_v21  ;;  %v833_v21 = vld [vmem:[#allocation10 + $0x160] sm:$0xff] }
 0x196   :  { %1346 = vmatpush1.bf16.msra.mxu1 %v1345_v26  ;;  %v800_v26 = vld [vmem:[#allocation10 + $0x58] sm:$0xff]  ;;  %1448 = vmatprep.subr.bf16.mxu0 %v1447_v22  ;;  %v835_v22 = vld [vmem:[#allocation10 + $0x170] sm:$0xff] }
 0x197   :  { %1348 = vmatprep.subr.bf16.mxu1 %v1347_v27  ;;  %v1449_v27 = vpack.c.bf16 %v795_v24, %v793_v23  ;;  %v1451_v28 = vpack.c.bf16 %v800_v26, %v798_v25  ;;  %v338_v23 = vlaneseq  ;;  %v838_v24 = vld [vmem:[#allocation10 + $0x188] sm:$0xff]  ;;  %v840_v25 = vld [vmem:[#allocation10 + $0x198] sm:$0xff]  ;;  %v1489_v26 = vpack.c.bf16 %v835_v22, %v833_v21  ;;  %v586_v21 = vld [vmem:[#allocation8 + $0x290] sm:$0xff] }
 0x198   :  { %v589_v22 = vld [vmem:[#allocation8 + $0x2a8] sm:$0xff] }
 0x199   :  { %1450 = vmatpush1.bf16.msra.mxu0 %v1449_v27  ;;  %v1491_v27 = vpack.c.bf16 %v840_v25, %v838_v24 }
 0x19a   :  { %1350 = vmatpush1.bf16.msra.mxu1 %v1349_v32  ;;  %v804_v32 = vld [vmem:[#allocation10 + $0x78] sm:$0xff]  ;;  %1452 = vmatprep.subr.bf16.mxu0 %v1451_v28  ;;  %v837_v28 = vld [vmem:[#allocation10 + $0x180] sm:$0xff] }
 0x19b   :  { %1352 = vmatprep.subr.bf16.mxu1 %v1351_v33  ;;  %v1453_v33 = vpack.c.bf16 %v799_v30, %v797_v29  ;;  %v1455_v34 = vpack.c.bf16 %v804_v32, %v802_v31  ;;  %v839_v29 = vld [vmem:[#allocation10 + $0x190] sm:$0xff]  ;;  %v1908_v30 = vshrl.u32 %v338_v23, 7  ;;  %v842_v31 = vld [vmem:[#allocation10 + $0x1a8] sm:$0xff]  ;;  %v844_v32 = vld [vmem:[#allocation10 + $0x1b8] sm:$0xff] }
 0x19c   :  { %v591_v23 = vld [vmem:[#allocation8 + $0x2b8] sm:$0xff] }
 0x19d   :  { %1454 = vmatpush1.bf16.msra.mxu0 %v1453_v33  ;;  %v1493_v33 = vpack.c.bf16 %v839_v29, %v837_v28  ;;  %v1399_v25 = vpack.c.bf16 %v591_v23, %v589_v22  ;;  %v593_v28 = vld [vmem:[#allocation8 + $0x2c8] sm:$0xff]  ;;  %v595_v29 = vld [vmem:[#allocation8 + $0x2d8] sm:$0xff]  ;;  %v348_v22 = vsub.s32 2, %v1908_v30 }
 0x19e   :  { %1354 = vmatpush1.bf16.msra.mxu1 %v1353_v38  ;;  %v808_v38 = vld [vmem:[#allocation10 + $0x98] sm:$0xff]  ;;  %1456 = vmatprep.subr.bf16.mxu0 %v1455_v34  ;;  %v1495_v34 = vpack.c.bf16 %v844_v32, %v842_v31  ;;  %v1403_v32 = vpack.c.bf16 %v595_v29, %v593_v28 }
 0x19f   :  { %1356 = vmatprep.subr.bf16.mxu1 %v1355_v39  ;;  %v1457_v39 = vpack.c.bf16 %v803_v36, %v801_v35  ;;  %v1459_v40 = vpack.c.bf16 %v808_v38, %v806_v37  ;;  %v841_v35 = vld [vmem:[#allocation10 + $0x1a0] sm:$0xff]  ;;  %v843_v36 = vld [vmem:[#allocation10 + $0x1b0] sm:$0xff]  ;;  %v1911_v37 = vsub.s32 0, %v1908_v30  ;;  %v846_v38 = vld [vmem:[#allocation10 + $0x1c8] sm:$0xff] }
 0x1a1   :  { %1458 = vmatpush1.bf16.msra.mxu0 %v1457_v39  ;;  %v848_v39 = vld [vmem:[#allocation10 + $0x1d8] sm:$0xff] }
 0x1a2   :  { %1358 = vmatpush1.bf16.msra.mxu1 %v1357_v44  ;;  %v812_v44 = vld [vmem:[#allocation10 + $0xb8] sm:$0xff]  ;;  %1460 = vmatprep.subr.bf16.mxu0 %v1459_v40 }
 0x1a3   :  { %1360 = vmatprep.subr.bf16.mxu1 %v1359_v45  ;;  %v1461_v45 = vpack.c.bf16 %v807_v42, %v805_v41  ;;  %v1463_v46 = vpack.c.bf16 %v812_v44, %v810_v43  ;;  %v1913_v40 = vld [vmem:[#allocation13 + $0x1] ss:$8 sm:$0xf]  ;;  %v1916_v41 = vsub.s32 1, %v1908_v30  ;;  %v352_v42 = vsub.s32 3, %v1908_v30 }
 0x1a4   :  { %v1497_v43 = vpack.c.bf16 %v843_v36, %v841_v35  ;;  %v1499_v44 = vpack.c.bf16 %v848_v39, %v846_v38  ;;  %v597_v35 = vld [vmem:[#allocation8 + $0x2e8] sm:$0xff]  ;;  %v599_v36 = vld [vmem:[#allocation8 + $0x2f8] sm:$0xff]  ;;  %v349_v29 = vrot.slane %v1913_v40, %v348_v22 }
 0x1a5   :  { %1462 = vmatpush1.bf16.msra.mxu0 %v1461_v45  ;;  %v341_v45 = vrot.slane %v1913_v40, %v1911_v37  ;;  %v1407_v39 = vpack.c.bf16 %v599_v36, %v597_v35  ;;  %v845_v36 = vld [vmem:[#allocation10 + $0x1c0] sm:$0xff] }
 0x1a6   :  { %1362 = vmatpush1.bf16.msra.mxu1 %v1361_v50  ;;  %v816_v50 = vld [vmem:[#allocation10 + $0xd8] sm:$0xff]  ;;  %1464 = vmatprep.subr.bf16.mxu0 %v1463_v46  ;;  %v345_v46 = vrot.slane %v1913_v40, %v1916_v41 }
 0x1a7   :  { %1364 = vmatprep.subr.bf16.mxu1 %v1363_v51  ;;  %v1465_v51 = vpack.c.bf16 %v811_v48, %v809_v47  ;;  %v1467_v10 = vpack.c.bf16 %v816_v50, %v814_v49  ;;  %v353_v47 = vrot.slane %v1913_v40, %v352_v42  ;;  %v596_v42 = vld [vmem:[#allocation8 + $0x2e0] sm:$0xff] }
 0x1a8   :  { %v849_v40 = vld [vmem:[#allocation10 + $0x1e0] sm:$0xff] }
 0x1a9   :  { %1466 = vmatpush1.bf16.msra.mxu0 %v1465_v51 }
 0x1aa   :  { %1366 = vmatpush1.bf16.msra.mxu1 %v1365_v55  ;;  %v820_v55 = vld [vmem:[#allocation10 + $0xf8] sm:$0xff]  ;;  %1468 = vmatprep.subr.bf16.mxu0 %v1467_v10 }
 0x1ab   :  { %1368 = vmatprep.subr.bf16.mxu1 %v1367_v56  ;;  %v1469_v56 = vpack.c.bf16 %v815_v53, %v813_v52  ;;  %v1471_v57 = vpack.c.bf16 %v820_v55, %v818_v54  ;;  %v568_v52 = vld [vmem:[#allocation8 + $0x200] sm:$0xff]  ;;  %v570_v53 = vld [vmem:[#allocation8 + $0x210] sm:$0xff] }
 0x1ad   :  { %1470 = vmatpush1.bf16.msra.mxu0 %v1469_v56  ;;  %v573_v56 = vld [vmem:[#allocation8 + $0x228] sm:$0xff] }
 0x1ae   :  { %1370 = vmatpush1.bf16.msra.mxu1 %v1369_v61  ;;  %v824_v61 = vld [vmem:[#allocation10 + $0x118] sm:$0xff]  ;;  %1472 = vmatprep.subr.bf16.mxu0 %v1471_v57 }
 0x1af   :  { %1372 = vmatprep.subr.bf16.mxu1 %v1371_v62  ;;  %v1473_v62 = vpack.c.bf16 %v819_v59, %v817_v58  ;;  %v1475_v63 = vpack.c.bf16 %v824_v61, %v822_v60  ;;  %v575_v57 = vld [vmem:[#allocation8 + $0x238] sm:$0xff]  ;;  %v1381_v59 = vpack.c.bf16 %v570_v53, %v568_v52 }
 0x1b0   :  { %v1383_v61 = vpack.c.bf16 %v575_v57, %v573_v56  ;;  %v609_v56 = vld [vmem:[#allocation8 + $0x348] sm:$0xff]  ;;  %v611_v57 = vld [vmem:[#allocation8 + $0x358] sm:$0xff] }
 0x1b1   :  { %1474 = vmatpush1.bf16.msra.mxu0 %v1473_v62  ;;  %v572_v62 = vld [vmem:[#allocation8 + $0x220] sm:$0xff] }
 0x1b2   :  { %1374 = vmatpush1.bf16.msra.mxu1 %v1373_v3  ;;  %v823_v3 = vld [vmem:[#allocation10 + $0x110] sm:$0xff]  ;;  %1476 = vmatprep.subr.bf16.mxu0 %v1475_v63 }
 0x1b3   :  { %1376 = vmatprep.subr.bf16.mxu1 %v1375_v6  ;;  %v1477_v6 = vpack.c.bf16 %v823_v3, %v821_v2  ;;  %v574_v63 = vld [vmem:[#allocation8 + $0x230] sm:$0xff]  ;;  %v577_v3 = vld [vmem:[#allocation8 + $0x248] sm:$0xff] }
 0x1b4   :  { %v1385_v5 = vpack.c.bf16 %v574_v63, %v572_v62  ;;  %v613_v62 = vld [vmem:[#allocation8 + $0x368] sm:$0xff]  ;;  %v615_v63 = vld [vmem:[#allocation8 + $0x378] sm:$0xff] }
 0x1b5   :  { %1478 = vmatpush1.bf16.msra.mxu0 %v1477_v6  ;;  %v1387_v6 = vpack.c.bf16 %v579_v4, %v577_v3  ;;  %v1423_v3 = vpack.c.bf16 %v615_v63, %v613_v62  ;;  %v612_v4 = vld [vmem:[#allocation8 + $0x360] sm:$0xff]  ;;  %v944_v62 = vld [vmem:[#allocation11 + $0x28] sm:$0xff] }
 0x1b6   :  { %1378 = vmatpush1.bf16.msra.mxu1 %v1377_v9  ;;  %v827_v9 = vld [vmem:[#allocation10 + $0x130] sm:$0xff]  ;;  %1480 = vmatprep.subr.bf16.mxu0 %v1479_v7  ;;  %v576_v7 = vld [vmem:[#allocation8 + $0x240] sm:$0xff] }
 0x1b7   :  { %1380 = vmatprep.subr.bf16.mxu1 %v1379_v13  ;;  %v1481_v13 = vpack.c.bf16 %v827_v9, %v825_v8  ;;  %v578_v8 = vld [vmem:[#allocation8 + $0x250] sm:$0xff]  ;;  %v581_v9 = vld [vmem:[#allocation8 + $0x268] sm:$0xff] }
 0x1b8   :  { %v1389_v12 = vpack.c.bf16 %v578_v8, %v576_v7  ;;  %v619_v7 = vld [vmem:[#allocation8 + $0x398] sm:$0xff] }
 0x1b9   :  { %1482 = vmatpush1.bf16.msra.mxu0 %v1481_v13  ;;  %v1391_v13 = vpack.c.bf16 %v583_v11, %v581_v9  ;;  %v616_v11 = vld [vmem:[#allocation8 + $0x380] sm:$0xff] }
 0x1ba   :  { %1484 = vmatprep.subr.bf16.mxu0 %v1483_v14  ;;  %v580_v14 = vld [vmem:[#allocation8 + $0x260] sm:$0xff] }
 0x1bb   :  { %v1393_v18 = vpack.c.bf16 %v582_v15, %v580_v14  ;;  %v623_v14 = vld [vmem:[#allocation8 + $0x3b8] sm:$0xff] }
 0x1bd   :  { %1486 = vmatpush1.bf16.msra.mxu0 %v1485_v19  ;;  %v1395_v19 = vpack.c.bf16 %v587_v17, %v585_v16  ;;  %v620_v17 = vld [vmem:[#allocation8 + $0x3a0] sm:$0xff] }
 0x1be   :  { %1488 = vmatprep.subr.bf16.mxu0 %v1487_v20  ;;  %v584_v20 = vld [vmem:[#allocation8 + $0x280] sm:$0xff] }
 0x1bf   :  { %v1397_v24 = vpack.c.bf16 %v586_v21, %v584_v20  ;;  %v627_v20 = vld [vmem:[#allocation8 + $0x3d8] sm:$0xff] }
 0x1c1   :  { %1490 = vmatpush1.bf16.msra.mxu0 %v1489_v26  ;;  %v588_v26 = vld [vmem:[#allocation8 + $0x2a0] sm:$0xff] }
 0x1c2   :  { %1492 = vmatprep.subr.bf16.mxu0 %v1491_v27  ;;  %v590_v27 = vld [vmem:[#allocation8 + $0x2b0] sm:$0xff] }
 0x1c3   :  { %v1401_v31 = vpack.c.bf16 %v590_v27, %v588_v26  ;;  %v629_v26 = vld [vmem:[#allocation8 + $0x3e8] sm:$0xff]  ;;  %v631_v27 = vld [vmem:[#allocation8 + $0x3f8] sm:$0xff] }
 0x1c5   :  { %1494 = vmatpush1.bf16.msra.mxu0 %v1493_v33  ;;  %v592_v33 = vld [vmem:[#allocation8 + $0x2c0] sm:$0xff] }
 0x1c6   :  { %1496 = vmatprep.subr.bf16.mxu0 %v1495_v34  ;;  %v594_v34 = vld [vmem:[#allocation8 + $0x2d0] sm:$0xff] }
 0x1c7   :  { %v1405_v38 = vpack.c.bf16 %v594_v34, %v592_v33  ;;  %v630_v33 = vld [vmem:[#allocation8 + $0x3f0] sm:$0xff] }
 0x1c9   :  { %1498 = vmatpush1.bf16.msra.mxu0 %v1497_v43  ;;  %v598_v43 = vld [vmem:[#allocation8 + $0x2f0] sm:$0xff] }
 0x1ca   :  { %1500 = vmatprep.subr.bf16.mxu0 %v1499_v44  ;;  %v601_v44 = vld [vmem:[#allocation8 + $0x308] sm:$0xff] }
 0x24c   :  { %v424_v48 = vpop.f32.mrb[0].mxu1  ;;  %v1924_v49 = vpop.f32.mrb[2].mxu0 }
 0x24d   :  { %v425_v50 = vadd.f32 %v424_v48, %v341_v45  ;;  %v426_v51 = vpop.f32.mrb[1].mxu1  ;;  %v497_v10 = vpop.f32.mrb[3].mxu0  ;;  %v603_v45 = vld [vmem:[#allocation8 + $0x318] sm:$0xff]  ;;  %v600_v48 = vld [vmem:[#allocation8 + $0x300] sm:$0xff]  ;;  %v496_v35 = vadd.f32 %v1924_v49, %v349_v29 }
 0x24e   :  { %v427_v54 = vadd.f32 %v426_v51, %v345_v46  ;;  %v498_v55 = vadd.f32 %v497_v10, %v353_v47  ;;  %v1409_v46 = vpack.c.bf16 %v598_v43, %v596_v42  ;;  %v1411_v47 = vpack.c.bf16 %v603_v45, %v601_v44  ;;  %v605_v51 = vld [vmem:[#allocation8 + $0x328] sm:$0xff]  ;;  %v607_v10 = vld [vmem:[#allocation8 + $0x338] sm:$0xff]  ;;  %v851_v45 = vld [vmem:[#allocation10 + $0x1f0] sm:$0xff] }
 0x24f   :  { %v500_v60 = vmax.f32 %v425_v50, 0.0  ;;  %v602_v50 = vld [vmem:[#allocation8 + $0x310] sm:$0xff]  ;;  %v1415_v53 = vpack.c.bf16 %v607_v10, %v605_v51  ;;  %v502_v30 = vmax.f32 %v496_v35, 0.0  ;;  %v850_v42 = vld [vmem:[#allocation10 + $0x1e8] sm:$0xff]  ;;  %v852_v43 = vld [vmem:[#allocation10 + $0x1f8] sm:$0xff] }
 0x250   :  { %v501_v58 = vmax.f32 %v427_v54, 0.0  ;;  %v503_v2 = vmax.f32 %v498_v55, 0.0  ;;  %v1413_v52 = vpack.c.bf16 %v602_v50, %v600_v48  ;;  %v604_v54 = vld [vmem:[#allocation8 + $0x320] sm:$0xff]  ;;  %v606_v55 = vld [vmem:[#allocation8 + $0x330] sm:$0xff]  ;;  %v1503_v44 = vpack.c.bf16 %v852_v43, %v850_v42 }
 0x252   :  { %709 = vmatprep.mubr.f32.mxu1 %v501_v58  ;;  %v1417_v58 = vpack.c.bf16 %v606_v55, %v604_v54 }
 0x253   :  { %710 = vmatmul.mubr.f32.vlgmr.msra.gmra.mrb[2].mxu1 %v500_v60  ;;  %v608_v60 = vld [vmem:[#allocation8 + $0x340] sm:$0xff] }
 0x254   :  { %1382 = vmatpush1.bf16.msra.mxu1 %v1381_v59  ;;  %780 = vmatprep.mubr.f32.mxu1 %v503_v2  ;;  %v1419_v59 = vpack.c.bf16 %v611_v57, %v609_v56 }
 0x255   :  { %1384 = vmatprep.subr.bf16.mxu1 %v1383_v61  ;;  %v610_v61 = vld [vmem:[#allocation8 + $0x350] sm:$0xff] }
 0x256   :  { %v1421_v2 = vpack.c.bf16 %v610_v61, %v608_v60  ;;  %v943_v61 = vld [vmem:[#allocation11 + $0x20] sm:$0xff] }
 0x257   :  { %v1514_v63 = vpack.c.bf16 %v944_v62, %v943_v61 }
 0x258   :  { %1386 = vmatpush1.bf16.msra.mxu1 %v1385_v5  ;;  %v614_v5 = vld [vmem:[#allocation8 + $0x370] sm:$0xff] }
 0x259   :  { %1388 = vmatprep.subr.bf16.mxu1 %v1387_v6  ;;  %v617_v6 = vld [vmem:[#allocation8 + $0x388] sm:$0xff]  ;;  %v1425_v8 = vpack.c.bf16 %v614_v5, %v612_v4  ;;  %v947_v5 = vld [vmem:[#allocation11 + $0x40] sm:$0xff] }
 0x25a   :  { %v1427_v9 = vpack.c.bf16 %v619_v7, %v617_v6  ;;  %v948_v6 = vld [vmem:[#allocation11 + $0x48] sm:$0xff] }
 0x25b   :  { %v1520_v7 = vpack.c.bf16 %v948_v6, %v947_v5 }
 0x25c   :  { %1390 = vmatpush1.bf16.msra.mxu1 %v1389_v12  ;;  %v618_v12 = vld [vmem:[#allocation8 + $0x390] sm:$0xff] }
 0x25d   :  { %1392 = vmatprep.subr.bf16.mxu1 %v1391_v13  ;;  %v621_v13 = vld [vmem:[#allocation8 + $0x3a8] sm:$0xff]  ;;  %v1429_v15 = vpack.c.bf16 %v618_v12, %v616_v11  ;;  %v951_v11 = vld [vmem:[#allocation11 + $0x60] sm:$0xff] }
 0x25e   :  { %v1431_v16 = vpack.c.bf16 %v623_v14, %v621_v13  ;;  %v952_v12 = vld [vmem:[#allocation11 + $0x68] sm:$0xff]  ;;  %v953_v14 = vld [vmem:[#allocation11 + $0x70] sm:$0xff] }
 0x25f   :  { %v1526_v13 = vpack.c.bf16 %v952_v12, %v951_v11 }
 0x260   :  { %1394 = vmatpush1.bf16.msra.mxu1 %v1393_v18  ;;  %v622_v18 = vld [vmem:[#allocation8 + $0x3b0] sm:$0xff] }
 0x261   :  { %1396 = vmatprep.subr.bf16.mxu1 %v1395_v19  ;;  %v625_v19 = vld [vmem:[#allocation8 + $0x3c8] sm:$0xff]  ;;  %v1433_v21 = vpack.c.bf16 %v622_v18, %v620_v17 }
 0x262   :  { %v1435_v23 = vpack.c.bf16 %v627_v20, %v625_v19  ;;  %v854_v17 = vld [vmem:[#allocation13 + $0x3] ss:$8 sm:$0x3] }
 0x263   :  { %v859_v18 = vrot.slane %v854_v17, %v1911_v37 }
 0x264   :  { %1398 = vmatpush1.bf16.msra.mxu1 %v1397_v24  ;;  %v624_v24 = vld [vmem:[#allocation8 + $0x3c0] sm:$0xff] }
 0x265   :  { %1400 = vmatprep.subr.bf16.mxu1 %v1399_v25  ;;  %v626_v25 = vld [vmem:[#allocation8 + $0x3d0] sm:$0xff] }
 0x266   :  { %v1437_v28 = vpack.c.bf16 %v626_v25, %v624_v24 }
 0x268   :  { %1402 = vmatpush1.bf16.msra.mxu1 %v1401_v31  ;;  %v1439_v31 = vpack.c.bf16 %v631_v27, %v629_v26  ;;  %v1033_v27 = vld [vmem:[#allocation13 + $0x4] ss:$0 sm:$0xff] }
 0x269   :  { %1404 = vmatprep.subr.bf16.mxu1 %v1403_v32  ;;  %v628_v32 = vld [vmem:[#allocation8 + $0x3e0] sm:$0xff] }
 0x26a   :  { %v1441_v34 = vpack.c.bf16 %v630_v33, %v628_v32 }
 0x26c   :  { %1406 = vmatpush1.bf16.msra.mxu1 %v1405_v38  ;;  %v847_v38 = vld [vmem:[#allocation10 + $0x1d0] sm:$0xff] }
 0x26d   :  { %1408 = vmatprep.subr.bf16.mxu1 %v1407_v39  ;;  %v1501_v39 = vpack.c.bf16 %v847_v38, %v845_v36 }
 0x26f   :  { %1502 = vmatpush1.bf16.msra.mxu0 %v1501_v39 }
 0x270   :  { %1410 = vmatpush1.bf16.msra.mxu1 %v1409_v46  ;;  %v1505_v46 = vpack.c.bf16 %v851_v45, %v849_v40  ;;  %1504 = vmatprep.subr.bf16.mxu0 %v1503_v44 }
 0x271   :  { %1412 = vmatprep.subr.bf16.mxu1 %v1411_v47  ;;  %v633_v47 = vld [vmem:[#allocation13 + $0x2] ss:$8 sm:$0x3] }
 0x272   :  { %v638_v49 = vrot.slane %v633_v47, %v1911_v37  ;;  %v642_v48 = vrot.slane %v633_v47, %v1916_v41 }
 0x273   :  { %1506 = vmatpush1.bf16.msra.mxu0 %v1505_v46 }
 0x274   :  { %1414 = vmatpush1.bf16.msra.mxu1 %v1413_v52  ;;  %1507 = vmatprep.subr.bf16.mxu0 %v1753_v0  ;;  %v939_v52 = vld [vmem:[#allocation11] sm:$0xff] }
 0x275   :  { %1416 = vmatprep.subr.bf16.mxu1 %v1415_v53  ;;  %v940_v53 = vld [vmem:[#allocation11 + $0x8] sm:$0xff] }
 0x276   :  { %v1508_v56 = vpack.c.bf16 %v940_v53, %v939_v52 }
 0x278   :  { %1418 = vmatpush1.bf16.msra.mxu1 %v1417_v58  ;;  %v941_v58 = vld [vmem:[#allocation11 + $0x10] sm:$0xff] }
 0x279   :  { %1420 = vmatprep.subr.bf16.mxu1 %v1419_v59  ;;  %v942_v59 = vld [vmem:[#allocation11 + $0x18] sm:$0xff] }
 0x27a   :  { %v1511_v60 = vpack.c.bf16 %v942_v59, %v941_v58 }
 0x27c   :  { %1422 = vmatpush1.bf16.msra.mxu1 %v1421_v2  ;;  %v945_v2 = vld [vmem:[#allocation11 + $0x30] sm:$0xff] }
 0x27d   :  { %1424 = vmatprep.subr.bf16.mxu1 %v1423_v3  ;;  %v946_v3 = vld [vmem:[#allocation11 + $0x38] sm:$0xff] }
 0x27e   :  { %v1517_v4 = vpack.c.bf16 %v946_v3, %v945_v2 }
 0x280   :  { %1426 = vmatpush1.bf16.msra.mxu1 %v1425_v8  ;;  %v950_v8 = vld [vmem:[#allocation11 + $0x58] sm:$0xff] }
 0x281   :  { %1428 = vmatprep.subr.bf16.mxu1 %v1427_v9 }
 0x284   :  { %1430 = vmatpush1.bf16.msra.mxu1 %v1429_v15  ;;  %v954_v15 = vld [vmem:[#allocation11 + $0x78] sm:$0xff] }
 0x285   :  { %1432 = vmatprep.subr.bf16.mxu1 %v1431_v16  ;;  %v1529_v16 = vpack.c.bf16 %v954_v15, %v953_v14 }
 0x288   :  { %1434 = vmatpush1.bf16.msra.mxu1 %v1433_v21 }
 0x289   :  { %1436 = vmatprep.subr.bf16.mxu1 %v1435_v23  ;;  %v863_v23 = vrot.slane %v854_v17, %v1916_v41 }
 0x28c   :  { %1438 = vmatpush1.bf16.msra.mxu1 %v1437_v28 }
 0x28d   :  { %1440 = vmatprep.subr.bf16.mxu1 %v1439_v31 }
 0x290   :  { %1442 = vmatpush1.bf16.msra.mxu1 %v1441_v34 }
 0x293   :  { %781 = vmatmul.mubr.f32.vlgmr.msra.gmra.mrb[2].mxu1 %v502_v30 }
 0x366   :  { %v782_v50 = vpop.f32.mrb[2].mxu1 }
 0x367   :  { %v1531_v51 = vadd.f32 %v782_v50, %v638_v49  ;;  %v784_v10 = vpop.f32.mrb[3].mxu1 }
 0x368   :  { %v1532_v54 = vadd.f32 %v784_v10, %v642_v48 }
 0x369   :  { %v787_v57 = vmax.f32 %v1531_v51, 0.0 }
 0x36a   :  { %v788_v55 = vmax.f32 %v1532_v54, 0.0 }
 0x36c   :  { %930 = vmatprep.mubr.f32.mxu0 %v788_v55 }
 0x36d   :  { %931 = vmatmul.mubr.f32.vlgmr.msra.gmra.mrb[4].mxu0 %v787_v57 }
 0x36e   :  { %1509 = vmatpush3.bf16.msra.mxu0 %v1508_v56  ;;  %1160 = vmatprep.mubr.msk.f32.mxu0 %vm1754_vm0, %v1755_v1  ;;  %v949_v1 = vld [vmem:[#allocation11 + $0x50] sm:$0xff] }
 0x36f   :  { %1510 = vmatprep.subr.bf16.mxu0 %v1753_v0  ;;  %v1523_v9 = vpack.c.bf16 %v950_v8, %v949_v1 }
 0x372   :  { %1512 = vmatpush3.bf16.msra.mxu0 %v1511_v60 }
 0x373   :  { %1513 = vmatprep.subr.bf16.mxu0 %v1753_v0 }
 0x376   :  { %1515 = vmatpush3.bf16.msra.mxu0 %v1514_v63 }
 0x377   :  { %1516 = vmatprep.subr.bf16.mxu0 %v1753_v0 }
 0x37a   :  { %1518 = vmatpush3.bf16.msra.mxu0 %v1517_v4 }
 0x37b   :  { %1519 = vmatprep.subr.bf16.mxu0 %v1753_v0 }
 0x37e   :  { %1521 = vmatpush3.bf16.msra.mxu0 %v1520_v7 }
 0x37f   :  { %1522 = vmatprep.subr.bf16.mxu0 %v1753_v0 }
 0x382   :  { %1524 = vmatpush3.bf16.msra.mxu0 %v1523_v9 }
 0x383   :  { %1525 = vmatprep.subr.bf16.mxu0 %v1753_v0 }
 0x386   :  { %1527 = vmatpush3.bf16.msra.mxu0 %v1526_v13 }
 0x387   :  { %1528 = vmatprep.subr.bf16.mxu0 %v1753_v0 }
 0x38a   :  { %1530 = vmatpush3.bf16.msra.mxu0 %v1529_v16 }
 0x440   :  { %v932_v19 = vpop.f32.mrb[4].mxu0 }
 0x441   :  { %v933_v20 = vadd.f32 %v932_v19, %v859_v18  ;;  %v934_v21 = vpop.f32.mrb[5].mxu0 }
 0x442   :  { %v935_v24 = vadd.f32 %v934_v21, %v863_v23 }
 0x443   :  { %v937_v22 = vmax.f32 %v933_v20, 0.0 }
 0x444   :  { %v938_v25 = vmax.f32 %v935_v24, 0.0 }
 0x445   :  { %1161 = vmatmul.mubr.f32.vlgmr.msra.gmra.mrb[6].mxu0 %v937_v22 }
 0x446   :  { %v1034_v31 = vmul.f32 %v1033_v27, %v938_v25 }
 0x448   :  { %v1035_v32 = vsel %vm1026_vm1, %v1034_v31, 0.0 }
 0x518   :  { %v1021_v26 = vpop.f32.mrb[6].mxu0 }
 0x519   :  { %v1162_v28 = vpop.f32.mrb[7].mxu0  ;;  %v1025_v0 = vmul.f32 %v1021_v26, %v1021_v26 }
 0x51b   :  { %v1027_v29 = vsel %vm1026_vm1, %v1025_v0, 0.0 }
 0x51c   :  { %1028 = vadd.xlane.f32.xlu0 %v1027_v29 }
 0x520   :  { %1036 = vadd.xlane.f32.xlu0 %v1035_v32 }
 0x5a9   :  { %v1029_v37 = vpop.xlane.xlu0 %1028 }
 0x5aa   :  { %v1030_v33 = vmax.f32 %v1029_v37, 1e-24 }
 0x5ac   :  { %1552 = vrsqrt.f32 %v1030_v33 }
 0x5ad   :  { %v1037_v34 = vpop.xlane.xlu0 %1036 }
 0x5ae   :  { %v1038_v30 = vmax.f32 %v1037_v34, 0.0 }
 0x5b6   :  { %v1553_v35 = vpop.eup %1552 }
 0x5b7   :  { %v1032_v41 = vmul.f32 %v1553_v35, %v1021_v26 }
 0x5b9   :  { %v1039_v36 = vmul.f32 %v1038_v30, %v1032_v41 }
 0x5bb   :  { %1040 = vst [vmem:[#allocation14] sm:$0xf] %v1039_v36 }
 0x5bc   :  { %1719 = shalt.err (!%p1716_p4)
}
 0x5bd   :  { %s1720_s16 = scalar_lea.hbm %s1962_s7, 64 }
 0x5be   :  { %p1721_p5 = scmp.ne.s32.totalorder %s1962_s7, %s1720_s16  ;;  %p1724_p6 = scmp.lt.u32.totalorder %s1720_s16, %s1962_s7 }
 0x5c0   :  { %p1726_p7 = pnand %p1724_p6, %p1721_p5 }
 0x5c2   :  { %1729 = shalt.err (!%p1726_p7)
}
 0x5c3   :  { %1050 = dma.vmem_to_hbm [thread:$0]  %s1048_s25, 64, %s1962_s7, [#allocation4]  }
 0x5c4   :  { %1738 = dma.done.wait [#allocation4], 64  }
 0x5c5   :  { %1739 = vsyncadd [#allocation4], 4294967232 }
 0x5c6   :  { %1054 = vsyncpa [#allocation3], 1 }
 0x5c7   :  { %1055 = vsyncpa [#allocation6], 1 }
 0x5c8   :  { %1056 = vsyncpa [#allocation9], 1 }
 0x5c9   :  { %1057 = vsyncpa [#allocation12], 1 }
 0x5ca   :  { %1058 = vsyncpa [#allocation4], 1 }

</bundles_post_ra>
